<compile_context>
chip_gen: v5e
topology: v5e:2x2
jax: 0.10.0
libtpu: 0.0.40
codegen_flags: <defaults>
</compile_context>

<pallas_src>
import jax
import jax.numpy as jnp
from jax.experimental import pallas as pl
from jax.experimental.pallas import tpu as pltpu

BN_EPS = 1e-5

# Conv hyper-parameters fixed by the module: (Cout, Cin, K, stride, pad)
LAYER_DEFS = (
    (32, 1, 5, 4, 2),
    (64, 32, 5, 4, 2),
    (80, 64, 3, 4, 1),
)

_OFF = 8  # sublane-aligned start row of the real activation body inside scratch


def _conv_out_len(l, k, s, p):
    return (l + 2 * p - k) // s + 1


# --------------------------- fused Pallas forward ----------------------------

def _feature_forward(x, fused):
    """x: (B, L) or (B, 1, L).  fused: 6-tuple of BN-folded conv params.
    Returns (B, T3, 80) float32, already in the module's permuted NWC layout."""
    if x.ndim == 3:
        x = x[:, 0, :]
    x = x.astype(jnp.float32)
    B, L = x.shape
    (C1, _, K1, S1, P1), (C2, _, K2, S2, P2), (C3, _, K3, S3, P3) = LAYER_DEFS
    T1 = _conv_out_len(L, K1, S1, P1)
    T2 = _conv_out_len(T1, K2, S2, P2)
    T3 = _conv_out_len(T2, K3, S3, P3)
    w1t, b1v, w2t, b2v, w3t, b3v = fused

    # Contiguous per-batch slab: pad the waveform and fold the stride into a
    # trailing size-4 "phase" axis.  rows == T1 + 1, so layer-1 tap 4 (offset
    # +4 samples) is simply "same column, next row".
    rows = (L + 2 * P1 + S1 - 1) // S1
    rpad = rows * S1 - L - P1
    xr = jnp.pad(x, ((0, 0), (P1, rpad))).reshape(B, rows, S1)

    def kernel(xr_ref, w1_ref, b1_ref, w2_ref, b2_ref, w3_ref, b3_ref,
               o_ref, h1_ref, h2_ref):
        # ---- layer 1: Conv1d(1->32, k5, s4) + BN + ReLU  (VPU, 5 broadcast FMAs) ----
        acc1 = jnp.zeros((T1, C1), jnp.float32)
        for j in range(K1):
            r0, c = divmod(j, S1)                       # taps 0-3: (0, j); tap 4: (1, 0)
            tap = xr_ref[r0:r0 + T1, c:c + 1]           # (T1, 1)
            acc1 = acc1 + tap * w1_ref[j:j + 1, :]      # broadcast FMA -> (T1, C1)
        h1 = jnp.maximum(acc1 + b1_ref[...], 0.0)       # (T1, C1) f32

        # Zero only the leading pad rows (every step), then one aligned body store.
        h1_ref[_OFF - P2:_OFF, :] = jnp.zeros((P2, C1), jnp.float32)
        h1_ref[_OFF:_OFF + T1, :] = h1

        # ---- layer 2: Conv1d(32->64, k5, s4) + BN + ReLU  (MXU bf16, per-tap acc) ----
        acc2 = jnp.zeros((T2, C2), jnp.float32)
        for j in range(K2):
            tap = h1_ref[pl.ds(_OFF - P2 + j, T2, stride=S2), :].astype(jnp.bfloat16)
            acc2 = acc2 + jnp.dot(tap, w2_ref[j * C1:(j + 1) * C1, :],
                                  preferred_element_type=jnp.float32)
        h2 = jnp.maximum(acc2 + b2_ref[...], 0.0)       # (T2, C2) f32

        h2_ref[_OFF - P3:_OFF, :] = jnp.zeros((P3, C2), jnp.float32)
        h2_ref[_OFF:_OFF + T2, :] = h2

        # ---- layer 3: Conv1d(64->80, k3, s4) + BN + ReLU -> (T3, C3) == NWC ----
        acc3 = jnp.zeros((T3, C3), jnp.float32)
        for j in range(K3):
            tap = h2_ref[pl.ds(_OFF - P3 + j, T3, stride=S3), :].astype(jnp.bfloat16)
            acc3 = acc3 + jnp.dot(tap, w3_ref[j * C2:(j + 1) * C2, :],
                                  preferred_element_type=jnp.float32)
        o_ref[...] = jnp.maximum(acc3 + b3_ref[...], 0.0)   # no wrapper permute needed

    return pl.pallas_call(
        kernel,
        out_shape=jax.ShapeDtypeStruct((B, T3, C3), jnp.float32),
        grid_spec=pltpu.PrefetchScalarGridSpec(
            num_scalar_prefetch=0,
            grid=(B,),
            in_specs=[
                pl.BlockSpec((None, rows, S1), lambda b: (b, 0, 0)),   # waveform slab
                pl.BlockSpec((K1, C1), lambda b: (0, 0)),              # w1 (f32, VPU)
                pl.BlockSpec((1, C1), lambda b: (0, 0)),
                pl.BlockSpec((K2 * C1, C2), lambda b: (0, 0)),         # w2 (bf16, MXU)
                pl.BlockSpec((1, C2), lambda b: (0, 0)),
                pl.BlockSpec((K3 * C2, C3), lambda b: (0, 0)),         # w3 (bf16, MXU)
                pl.BlockSpec((1, C3), lambda b: (0, 0)),
            ],
            out_specs=pl.BlockSpec((None, T3, C3), lambda b: (b, 0, 0)),
            scratch_shapes=[
                pltpu.VMEM((_OFF + T1, C1), jnp.float32),   # layer-1 act, body at row 8
                pltpu.VMEM((_OFF + T2, C2), jnp.float32),   # layer-2 act, body at row 8
            ],
        ),
        compiler_params=pltpu.CompilerParams(dimension_semantics=("parallel",)),
    )(xr, w1t, b1v, w2t, b2v, w3t, b3v)


_feature_forward_jit = jax.jit(_feature_forward)


def feature_extractor(x, fused):
    """Mirrors DifferentiableFeatureExtractor.forward: returns (features, T)."""
    y = _feature_forward_jit(x, fused)
    return y, y.shape[1]


# ------------------------------ parameters -----------------------------------

def make_params(key):
    """Deterministic synthetic parameters matching the module's shapes."""
    params = []
    for (cout, cin, k, s, p) in LAYER_DEFS:
        key, *ks = jax.random.split(key, 7)
        fan_in = cin * k
        bound = 1.0 / jnp.sqrt(jnp.float32(fan_in))
        w = jax.random.uniform(ks[0], (cout, cin, k), jnp.float32, -bound, bound)
        b = jax.random.uniform(ks[1], (cout,), jnp.float32, -bound, bound)
        gamma = jax.random.uniform(ks[2], (cout,), jnp.float32, 0.5, 1.5)
        beta = 0.1 * jax.random.normal(ks[3], (cout,), jnp.float32)
        mean = 0.1 * jax.random.normal(ks[4], (cout,), jnp.float32)
        var = jax.random.uniform(ks[5], (cout,), jnp.float32, 0.5, 1.5)
        params.append((w, b, gamma, beta, mean, var, k, s, p))
    return params


def prepare_fused_params(params):
    """Fold eval-mode BN into the conv weights/bias; lay weights out as
    (K*Cin, Cout) so row block j*Cin:(j+1)*Cin is tap j's (Cin, Cout) matrix.
    Layers 2/3 (MXU) are stored bf16; layer 1 (VPU) stays f32."""
    fused = []
    for li, (w, b, gamma, beta, mean, var, k, s, p) in enumerate(params):
        cout, cin, kk = w.shape
        scale = gamma / jnp.sqrt(var + BN_EPS)                                  # (Cout,)
        w_t = jnp.transpose(w, (2, 1, 0)).reshape(kk * cin, cout) * scale[None, :]
        bias = (scale * (b - mean) + beta)[None, :]                             # (1, Cout)
        if li > 0:
            w_t = w_t.astype(jnp.bfloat16)
        fused.extend([w_t, bias])
    return tuple(fused)


# ------------------------------- reference ------------------------------------

def feature_extractor_ref(x, params):
    """Independent pure-JAX reference: lax.conv + explicit eval-mode BN + ReLU."""
    if x.ndim == 2:
        x = x[:, None, :]
    h = x.astype(jnp.float32)
    for (w, b, gamma, beta, mean, var, k, s, p) in params:
        y = jax.lax.conv_general_dilated(
            h, w, window_strides=(s,), padding=[(p, p)],
            dimension_numbers=("NCH", "OIH", "NCH"))
        y = y + b[None, :, None]
        y = (gamma[None, :, None] * (y - mean[None, :, None])
             / jnp.sqrt(var[None, :, None] + BN_EPS) + beta[None, :, None])
        h = jnp.maximum(y, 0.0)
    return jnp.transpose(h, (0, 2, 1))


# --------------------------------- main ---------------------------------------

if __name__ == "__main__":
    key = jax.random.PRNGKey(0)
    k_param, k_x = jax.random.split(key)

    params = make_params(k_param)
    fused = prepare_fused_params(params)

    B, L = 2, 1024                       # raw waveform (B, L) -> features (B, 16, 80)
    x = jax.random.normal(k_x, (B, L), jnp.float32)

    out, t_len = feature_extractor(x, fused)
    out = jax.block_until_ready(out)

    ref = jax.block_until_ready(feature_extractor_ref(x, params))

    assert out.shape == (B, 16, 80), out.shape
    assert t_len == 16, t_len
    max_err = float(jnp.max(jnp.abs(out - ref)))
    assert jnp.allclose(out, ref, rtol=1e-2, atol=1e-2), max_err

    print("KERNEL_OK")
</pallas_src>

<mosaic_0001>
module attributes {stable_mosaic.version = 11 : i64} {
  func.func @kernel(%arg0: i32, %arg1: memref<1x257x4xf32, #tpu.memory_space<vmem>>, %arg2: memref<5x32xf32, #tpu.memory_space<vmem>>, %arg3: memref<1x32xf32, #tpu.memory_space<vmem>>, %arg4: memref<160x64xbf16, #tpu.memory_space<vmem>>, %arg5: memref<1x64xf32, #tpu.memory_space<vmem>>, %arg6: memref<192x80xbf16, #tpu.memory_space<vmem>>, %arg7: memref<1x80xf32, #tpu.memory_space<vmem>>, %arg8: memref<1x16x80xf32, #tpu.memory_space<vmem>>, %arg9: memref<264x32xf32, #tpu.memory_space<vmem>>, %arg10: memref<72x64xf32, #tpu.memory_space<vmem>>) attributes {dimension_semantics = [#tpu.dimension_semantics<parallel>], iteration_bounds = array<i64: 2>, scalar_prefetch = 0 : i64, scratch_operands = 2 : i64, tpu.core_type = #tpu.core_type<tc>, window_params = [{transform_indices = @transform_0, window_bounds = array<i64: 1, 257, 4>}, {pipeline_mode = #tpu.pipeline_mode<synchronous>, transform_indices = @transform_1, window_bounds = array<i64: 5, 32>}, {pipeline_mode = #tpu.pipeline_mode<synchronous>, transform_indices = @transform_2, window_bounds = array<i64: 1, 32>}, {pipeline_mode = #tpu.pipeline_mode<synchronous>, transform_indices = @transform_3, window_bounds = array<i64: 160, 64>}, {pipeline_mode = #tpu.pipeline_mode<synchronous>, transform_indices = @transform_4, window_bounds = array<i64: 1, 64>}, {pipeline_mode = #tpu.pipeline_mode<synchronous>, transform_indices = @transform_5, window_bounds = array<i64: 192, 80>}, {pipeline_mode = #tpu.pipeline_mode<synchronous>, transform_indices = @transform_6, window_bounds = array<i64: 1, 80>}, {transform_indices = @transform_7, window_bounds = array<i64: 1, 16, 80>}]} {
    %cst = arith.constant 0.000000e+00 : f32
    %0 = vector.broadcast %cst : f32 to vector<256x32xf32>
    %c0 = arith.constant 0 : index
    %c0_0 = arith.constant 0 : index
    %c0_1 = arith.constant 0 : index
    %1 = vector.load %arg1[%c0, %c0_0, %c0_1] : memref<1x257x4xf32, #tpu.memory_space<vmem>>, vector<1x256x1xf32>
    %2 = vector.shape_cast %1 : vector<1x256x1xf32> to vector<256x1xf32>
    %c0_2 = arith.constant 0 : index
    %c0_3 = arith.constant 0 : index
    %3 = vector.load %arg2[%c0_2, %c0_3] : memref<5x32xf32, #tpu.memory_space<vmem>>, vector<1x32xf32>
    %4 = vector.broadcast %2 : vector<256x1xf32> to vector<256x32xf32>
    %5 = vector.broadcast %3 : vector<1x32xf32> to vector<256x32xf32>
    %6 = arith.mulf %4, %5 : vector<256x32xf32>
    %7 = arith.addf %0, %6 : vector<256x32xf32>
    %c0_4 = arith.constant 0 : index
    %c0_5 = arith.constant 0 : index
    %c1 = arith.constant 1 : index
    %8 = vector.load %arg1[%c0_4, %c0_5, %c1] : memref<1x257x4xf32, #tpu.memory_space<vmem>>, vector<1x256x1xf32>
    %9 = vector.shape_cast %8 : vector<1x256x1xf32> to vector<256x1xf32>
    %c1_6 = arith.constant 1 : index
    %c0_7 = arith.constant 0 : index
    %10 = vector.load %arg2[%c1_6, %c0_7] : memref<5x32xf32, #tpu.memory_space<vmem>>, vector<1x32xf32>
    %11 = vector.broadcast %9 : vector<256x1xf32> to vector<256x32xf32>
    %12 = vector.broadcast %10 : vector<1x32xf32> to vector<256x32xf32>
    %13 = arith.mulf %11, %12 : vector<256x32xf32>
    %14 = arith.addf %7, %13 : vector<256x32xf32>
    %c0_8 = arith.constant 0 : index
    %c0_9 = arith.constant 0 : index
    %c2 = arith.constant 2 : index
    %15 = vector.load %arg1[%c0_8, %c0_9, %c2] : memref<1x257x4xf32, #tpu.memory_space<vmem>>, vector<1x256x1xf32>
    %16 = vector.shape_cast %15 : vector<1x256x1xf32> to vector<256x1xf32>
    %c2_10 = arith.constant 2 : index
    %c0_11 = arith.constant 0 : index
    %17 = vector.load %arg2[%c2_10, %c0_11] : memref<5x32xf32, #tpu.memory_space<vmem>>, vector<1x32xf32>
    %18 = vector.broadcast %16 : vector<256x1xf32> to vector<256x32xf32>
    %19 = vector.broadcast %17 : vector<1x32xf32> to vector<256x32xf32>
    %20 = arith.mulf %18, %19 : vector<256x32xf32>
    %21 = arith.addf %14, %20 : vector<256x32xf32>
    %c0_12 = arith.constant 0 : index
    %c0_13 = arith.constant 0 : index
    %c3 = arith.constant 3 : index
    %22 = vector.load %arg1[%c0_12, %c0_13, %c3] : memref<1x257x4xf32, #tpu.memory_space<vmem>>, vector<1x256x1xf32>
    %23 = vector.shape_cast %22 : vector<1x256x1xf32> to vector<256x1xf32>
    %c3_14 = arith.constant 3 : index
    %c0_15 = arith.constant 0 : index
    %24 = vector.load %arg2[%c3_14, %c0_15] : memref<5x32xf32, #tpu.memory_space<vmem>>, vector<1x32xf32>
    %25 = vector.broadcast %23 : vector<256x1xf32> to vector<256x32xf32>
    %26 = vector.broadcast %24 : vector<1x32xf32> to vector<256x32xf32>
    %27 = arith.mulf %25, %26 : vector<256x32xf32>
    %28 = arith.addf %21, %27 : vector<256x32xf32>
    %c0_16 = arith.constant 0 : index
    %c1_17 = arith.constant 1 : index
    %c0_18 = arith.constant 0 : index
    %29 = vector.load %arg1[%c0_16, %c1_17, %c0_18] : memref<1x257x4xf32, #tpu.memory_space<vmem>>, vector<1x256x1xf32>
    %30 = vector.shape_cast %29 : vector<1x256x1xf32> to vector<256x1xf32>
    %c4 = arith.constant 4 : index
    %c0_19 = arith.constant 0 : index
    %31 = vector.load %arg2[%c4, %c0_19] : memref<5x32xf32, #tpu.memory_space<vmem>>, vector<1x32xf32>
    %32 = vector.broadcast %30 : vector<256x1xf32> to vector<256x32xf32>
    %33 = vector.broadcast %31 : vector<1x32xf32> to vector<256x32xf32>
    %34 = arith.mulf %32, %33 : vector<256x32xf32>
    %35 = arith.addf %28, %34 : vector<256x32xf32>
    %c0_20 = arith.constant 0 : index
    %c0_21 = arith.constant 0 : index
    %36 = vector.load %arg3[%c0_20, %c0_21] : memref<1x32xf32, #tpu.memory_space<vmem>>, vector<1x32xf32>
    %37 = vector.broadcast %36 : vector<1x32xf32> to vector<256x32xf32>
    %38 = arith.addf %35, %37 : vector<256x32xf32>
    %cst_22 = arith.constant 0.000000e+00 : f32
    %39 = vector.broadcast %cst_22 : f32 to vector<256x32xf32>
    %40 = arith.maximumf %38, %39 : vector<256x32xf32>
    %cst_23 = arith.constant 0.000000e+00 : f32
    %41 = vector.broadcast %cst_23 : f32 to vector<2x32xf32>
    %c6 = arith.constant 6 : index
    %c0_24 = arith.constant 0 : index
    %42 = vector.load %arg9[%c6, %c0_24] : memref<264x32xf32, #tpu.memory_space<vmem>>, vector<2x32xf32>
    tpu.vector_store %arg9[%c6, %c0_24], %41 {strides = array<i32>} : memref<264x32xf32, #tpu.memory_space<vmem>>, vector<2x32xf32>,
    %c8 = arith.constant 8 : index
    %c0_25 = arith.constant 0 : index
    %43 = vector.load %arg9[%c8, %c0_25] : memref<264x32xf32, #tpu.memory_space<vmem>>, vector<256x32xf32>
    tpu.vector_store %arg9[%c8, %c0_25], %40 {strides = array<i32>} : memref<264x32xf32, #tpu.memory_space<vmem>>, vector<256x32xf32>,
    %cst_26 = arith.constant 0.000000e+00 : f32
    %44 = vector.broadcast %cst_26 : f32 to vector<64x64xf32>
    %c6_27 = arith.constant 6 : index
    %c0_28 = arith.constant 0 : index
    %45 = tpu.strided_load %arg9[%c6_27, %c0_28] {strides = array<i32: 4, 1>} : memref<264x32xf32, #tpu.memory_space<vmem>>, vector<64x32xf32>
    %46 = arith.truncf %45 : vector<64x32xf32> to vector<64x32xbf16>
    %c0_29 = arith.constant 0 : index
    %c0_30 = arith.constant 0 : index
    %47 = vector.load %arg4[%c0_29, %c0_30] : memref<160x64xbf16, #tpu.memory_space<vmem>>, vector<32x64xbf16>
    %cst_31 = arith.constant dense<0.000000e+00> : vector<64x64xf32>
    %48 = tpu.matmul %46, %47, %cst_31 {dimension_numbers = #tpu.dot_dimension_numbers<[1], [0], [0], [1], [0, 0, 1, 1], [], []>} : vector<64x32xbf16>, vector<32x64xbf16>, vector<64x64xf32> -> vector<64x64xf32>
    %49 = arith.addf %44, %48 : vector<64x64xf32>
    %c7 = arith.constant 7 : index
    %c0_32 = arith.constant 0 : index
    %50 = tpu.strided_load %arg9[%c7, %c0_32] {strides = array<i32: 4, 1>} : memref<264x32xf32, #tpu.memory_space<vmem>>, vector<64x32xf32>
    %51 = arith.truncf %50 : vector<64x32xf32> to vector<64x32xbf16>
    %c32 = arith.constant 32 : index
    %c0_33 = arith.constant 0 : index
    %52 = vector.load %arg4[%c32, %c0_33] : memref<160x64xbf16, #tpu.memory_space<vmem>>, vector<32x64xbf16>
    %cst_34 = arith.constant dense<0.000000e+00> : vector<64x64xf32>
    %53 = tpu.matmul %51, %52, %cst_34 {dimension_numbers = #tpu.dot_dimension_numbers<[1], [0], [0], [1], [0, 0, 1, 1], [], []>} : vector<64x32xbf16>, vector<32x64xbf16>, vector<64x64xf32> -> vector<64x64xf32>
    %54 = arith.addf %49, %53 : vector<64x64xf32>
    %c8_35 = arith.constant 8 : index
    %c0_36 = arith.constant 0 : index
    %55 = tpu.strided_load %arg9[%c8_35, %c0_36] {strides = array<i32: 4, 1>} : memref<264x32xf32, #tpu.memory_space<vmem>>, vector<64x32xf32>
    %56 = arith.truncf %55 : vector<64x32xf32> to vector<64x32xbf16>
    %c64 = arith.constant 64 : index
    %c0_37 = arith.constant 0 : index
    %57 = vector.load %arg4[%c64, %c0_37] : memref<160x64xbf16, #tpu.memory_space<vmem>>, vector<32x64xbf16>
    %cst_38 = arith.constant dense<0.000000e+00> : vector<64x64xf32>
    %58 = tpu.matmul %56, %57, %cst_38 {dimension_numbers = #tpu.dot_dimension_numbers<[1], [0], [0], [1], [0, 0, 1, 1], [], []>} : vector<64x32xbf16>, vector<32x64xbf16>, vector<64x64xf32> -> vector<64x64xf32>
    %59 = arith.addf %54, %58 : vector<64x64xf32>
    %c9 = arith.constant 9 : index
    %c0_39 = arith.constant 0 : index
    %60 = tpu.strided_load %arg9[%c9, %c0_39] {strides = array<i32: 4, 1>} : memref<264x32xf32, #tpu.memory_space<vmem>>, vector<64x32xf32>
    %61 = arith.truncf %60 : vector<64x32xf32> to vector<64x32xbf16>
    %c96 = arith.constant 96 : index
    %c0_40 = arith.constant 0 : index
    %62 = vector.load %arg4[%c96, %c0_40] : memref<160x64xbf16, #tpu.memory_space<vmem>>, vector<32x64xbf16>
    %cst_41 = arith.constant dense<0.000000e+00> : vector<64x64xf32>
    %63 = tpu.matmul %61, %62, %cst_41 {dimension_numbers = #tpu.dot_dimension_numbers<[1], [0], [0], [1], [0, 0, 1, 1], [], []>} : vector<64x32xbf16>, vector<32x64xbf16>, vector<64x64xf32> -> vector<64x64xf32>
    %64 = arith.addf %59, %63 : vector<64x64xf32>
    %c10 = arith.constant 10 : index
    %c0_42 = arith.constant 0 : index
    %65 = tpu.strided_load %arg9[%c10, %c0_42] {strides = array<i32: 4, 1>} : memref<264x32xf32, #tpu.memory_space<vmem>>, vector<64x32xf32>
    %66 = arith.truncf %65 : vector<64x32xf32> to vector<64x32xbf16>
    %c128 = arith.constant 128 : index
    %c0_43 = arith.constant 0 : index
    %67 = vector.load %arg4[%c128, %c0_43] : memref<160x64xbf16, #tpu.memory_space<vmem>>, vector<32x64xbf16>
    %cst_44 = arith.constant dense<0.000000e+00> : vector<64x64xf32>
    %68 = tpu.matmul %66, %67, %cst_44 {dimension_numbers = #tpu.dot_dimension_numbers<[1], [0], [0], [1], [0, 0, 1, 1], [], []>} : vector<64x32xbf16>, vector<32x64xbf16>, vector<64x64xf32> -> vector<64x64xf32>
    %69 = arith.addf %64, %68 : vector<64x64xf32>
    %c0_45 = arith.constant 0 : index
    %c0_46 = arith.constant 0 : index
    %70 = vector.load %arg5[%c0_45, %c0_46] : memref<1x64xf32, #tpu.memory_space<vmem>>, vector<1x64xf32>
    %71 = vector.broadcast %70 : vector<1x64xf32> to vector<64x64xf32>
    %72 = arith.addf %69, %71 : vector<64x64xf32>
    %cst_47 = arith.constant 0.000000e+00 : f32
    %73 = vector.broadcast %cst_47 : f32 to vector<64x64xf32>
    %74 = arith.maximumf %72, %73 : vector<64x64xf32>
    %cst_48 = arith.constant 0.000000e+00 : f32
    %75 = vector.broadcast %cst_48 : f32 to vector<1x64xf32>
    %c7_49 = arith.constant 7 : index
    %c0_50 = arith.constant 0 : index
    %76 = vector.load %arg10[%c7_49, %c0_50] : memref<72x64xf32, #tpu.memory_space<vmem>>, vector<1x64xf32>
    tpu.vector_store %arg10[%c7_49, %c0_50], %75 {strides = array<i32>} : memref<72x64xf32, #tpu.memory_space<vmem>>, vector<1x64xf32>,
    %c8_51 = arith.constant 8 : index
    %c0_52 = arith.constant 0 : index
    %77 = vector.load %arg10[%c8_51, %c0_52] : memref<72x64xf32, #tpu.memory_space<vmem>>, vector<64x64xf32>
    tpu.vector_store %arg10[%c8_51, %c0_52], %74 {strides = array<i32>} : memref<72x64xf32, #tpu.memory_space<vmem>>, vector<64x64xf32>,
    %cst_53 = arith.constant 0.000000e+00 : f32
    %78 = vector.broadcast %cst_53 : f32 to vector<16x80xf32>
    %c7_54 = arith.constant 7 : index
    %c0_55 = arith.constant 0 : index
    %79 = tpu.strided_load %arg10[%c7_54, %c0_55] {strides = array<i32: 4, 1>} : memref<72x64xf32, #tpu.memory_space<vmem>>, vector<16x64xf32>
    %80 = arith.truncf %79 : vector<16x64xf32> to vector<16x64xbf16>
    %c0_56 = arith.constant 0 : index
    %c0_57 = arith.constant 0 : index
    %81 = vector.load %arg6[%c0_56, %c0_57] : memref<192x80xbf16, #tpu.memory_space<vmem>>, vector<64x80xbf16>
    %cst_58 = arith.constant dense<0.000000e+00> : vector<16x80xf32>
    %82 = tpu.matmul %80, %81, %cst_58 {dimension_numbers = #tpu.dot_dimension_numbers<[1], [0], [0], [1], [0, 0, 1, 1], [], []>} : vector<16x64xbf16>, vector<64x80xbf16>, vector<16x80xf32> -> vector<16x80xf32>
    %83 = arith.addf %78, %82 : vector<16x80xf32>
    %c8_59 = arith.constant 8 : index
    %c0_60 = arith.constant 0 : index
    %84 = tpu.strided_load %arg10[%c8_59, %c0_60] {strides = array<i32: 4, 1>} : memref<72x64xf32, #tpu.memory_space<vmem>>, vector<16x64xf32>
    %85 = arith.truncf %84 : vector<16x64xf32> to vector<16x64xbf16>
    %c64_61 = arith.constant 64 : index
    %c0_62 = arith.constant 0 : index
    %86 = vector.load %arg6[%c64_61, %c0_62] : memref<192x80xbf16, #tpu.memory_space<vmem>>, vector<64x80xbf16>
    %cst_63 = arith.constant dense<0.000000e+00> : vector<16x80xf32>
    %87 = tpu.matmul %85, %86, %cst_63 {dimension_numbers = #tpu.dot_dimension_numbers<[1], [0], [0], [1], [0, 0, 1, 1], [], []>} : vector<16x64xbf16>, vector<64x80xbf16>, vector<16x80xf32> -> vector<16x80xf32>
    %88 = arith.addf %83, %87 : vector<16x80xf32>
    %c9_64 = arith.constant 9 : index
    %c0_65 = arith.constant 0 : index
    %89 = tpu.strided_load %arg10[%c9_64, %c0_65] {strides = array<i32: 4, 1>} : memref<72x64xf32, #tpu.memory_space<vmem>>, vector<16x64xf32>
    %90 = arith.truncf %89 : vector<16x64xf32> to vector<16x64xbf16>
    %c128_66 = arith.constant 128 : index
    %c0_67 = arith.constant 0 : index
    %91 = vector.load %arg6[%c128_66, %c0_67] : memref<192x80xbf16, #tpu.memory_space<vmem>>, vector<64x80xbf16>
    %cst_68 = arith.constant dense<0.000000e+00> : vector<16x80xf32>
    %92 = tpu.matmul %90, %91, %cst_68 {dimension_numbers = #tpu.dot_dimension_numbers<[1], [0], [0], [1], [0, 0, 1, 1], [], []>} : vector<16x64xbf16>, vector<64x80xbf16>, vector<16x80xf32> -> vector<16x80xf32>
    %93 = arith.addf %88, %92 : vector<16x80xf32>
    %c0_69 = arith.constant 0 : index
    %c0_70 = arith.constant 0 : index
    %94 = vector.load %arg7[%c0_69, %c0_70] : memref<1x80xf32, #tpu.memory_space<vmem>>, vector<1x80xf32>
    %95 = vector.broadcast %94 : vector<1x80xf32> to vector<16x80xf32>
    %96 = arith.addf %93, %95 : vector<16x80xf32>
    %cst_71 = arith.constant 0.000000e+00 : f32
    %97 = vector.broadcast %cst_71 : f32 to vector<16x80xf32>
    %98 = arith.maximumf %96, %97 : vector<16x80xf32>
    %c0_72 = arith.constant 0 : index
    %c0_73 = arith.constant 0 : index
    %c0_74 = arith.constant 0 : index
    %99 = vector.load %arg8[%c0_72, %c0_73, %c0_74] : memref<1x16x80xf32, #tpu.memory_space<vmem>>, vector<1x16x80xf32>
    %100 = vector.shape_cast %99 : vector<1x16x80xf32> to vector<16x80xf32>
    %101 = vector.shape_cast %98 : vector<16x80xf32> to vector<1x16x80xf32>
    tpu.vector_store %arg8[%c0_72, %c0_73, %c0_74], %101 {strides = array<i32>} : memref<1x16x80xf32, #tpu.memory_space<vmem>>, vector<1x16x80xf32>,
    return
  }
  func.func @transform_0(%arg0: i32) -> (i32, i32, i32) {
    %c0_i32 = arith.constant 0 : i32
    %c0_i32_0 = arith.constant 0 : i32
    %c0_i32_1 = arith.constant 0 : i32
    return %arg0, %c0_i32, %c0_i32_0 : i32, i32, i32
  }
  func.func @transform_1(%arg0: i32) -> (i32, i32) {
    %c0_i32 = arith.constant 0 : i32
    %c0_i32_0 = arith.constant 0 : i32
    %c0_i32_1 = arith.constant 0 : i32
    return %c0_i32, %c0_i32_0 : i32, i32
  }
  func.func @transform_2(%arg0: i32) -> (i32, i32) {
    %c0_i32 = arith.constant 0 : i32
    %c0_i32_0 = arith.constant 0 : i32
    %c0_i32_1 = arith.constant 0 : i32
    return %c0_i32, %c0_i32_0 : i32, i32
  }
  func.func @transform_3(%arg0: i32) -> (i32, i32) {
    %c0_i32 = arith.constant 0 : i32
    %c0_i32_0 = arith.constant 0 : i32
    %c0_i32_1 = arith.constant 0 : i32
    return %c0_i32, %c0_i32_0 : i32, i32
  }
  func.func @transform_4(%arg0: i32) -> (i32, i32) {
    %c0_i32 = arith.constant 0 : i32
    %c0_i32_0 = arith.constant 0 : i32
    %c0_i32_1 = arith.constant 0 : i32
    return %c0_i32, %c0_i32_0 : i32, i32
  }
  func.func @transform_5(%arg0: i32) -> (i32, i32) {
    %c0_i32 = arith.constant 0 : i32
    %c0_i32_0 = arith.constant 0 : i32
    %c0_i32_1 = arith.constant 0 : i32
    return %c0_i32, %c0_i32_0 : i32, i32
  }
  func.func @transform_6(%arg0: i32) -> (i32, i32) {
    %c0_i32 = arith.constant 0 : i32
    %c0_i32_0 = arith.constant 0 : i32
    %c0_i32_1 = arith.constant 0 : i32
    return %c0_i32, %c0_i32_0 : i32, i32
  }
  func.func @transform_7(%arg0: i32) -> (i32, i32, i32) {
    %c0_i32 = arith.constant 0 : i32
    %c0_i32_0 = arith.constant 0 : i32
    %c0_i32_1 = arith.constant 0 : i32
    return %arg0, %c0_i32, %c0_i32_0 : i32, i32, i32
  }
}

</mosaic_0001>

<bundles_post_ra>
// kernel: _feature_forward.1
= control target key start
LH: loop header
LB: loop body
LE: loop exit
PB: predicated region body
PF: predicated region fallthrough
CT: control target
= control target key end

     0   :  { %12 = vsyncpa [#allocation5], 0  ;;  %s3581_s0 = inlined_call_operand.vmem [shape: f32[2,257,4], index: 0, kind: input, shape index: {}]   ;;  %s3582_s1 = inlined_call_operand.vmem [shape: f32[5,32], index: 1, kind: input, shape index: {}]   ;;  %s3583_s2 = inlined_call_operand.vmem [shape: f32[1,32], index: 2, kind: input, shape index: {}]   ;;  %s3584_s3 = inlined_call_operand.vmem [shape: bf16[160,64], index: 3, kind: input, shape index: {}]   ;;  %s3585_s4 = inlined_call_operand.vmem [shape: f32[1,64], index: 4, kind: input, shape index: {}]   ;;  %s3586_s5 = inlined_call_operand.vmem [shape: bf16[192,80], index: 5, kind: input, shape index: {}]   ;;  %s3587_s6 = inlined_call_operand.vmem [shape: f32[1,80], index: 6, kind: input, shape index: {}]   ;;  %s3588_s7 = inlined_call_operand.hbm [shape: f32[2,16,80], index: 7, kind: output, shape index: {}]  }
   0x1   :  { %14 = vsyncpa [#allocation5 + $0x1], 0  ;;  %s2520_s24 = smov 0   ;;  %s2522_s25 = smov 0  }
   0x2   :  { %s2524_s26 = smov 0   ;;  %s2526_s27 = smov 0  }
   0x3 LB: > { %s2541_s28 = sadd.s32 4294967295, %s2471_s27   ;;  %s2172_s29 = sadd.s32 4294967294, %s2471_s27   ;;  %s2471_s27 = sphi %s2526_s27, %s3661_s27   ;;  %s2467_s26 = sphi %s2524_s26, %s3660_s26   ;;  %s2463_s25 = sphi %s2522_s25, %s3659_s25   ;;  %s2459_s24 = sphi %s2520_s24, %s3658_s24  }
   0x4   : > { %s2545_s30 = sadd.s32 1, %s2471_s27   ;;  %s179_s8 = sadd.s32 1, %s2467_s26 }
   0x5   : > { %s176_s9 = ssub.s32 %s2471_s27, %s2545_s30  ;;  %p189_p0 = scmp.ne.s32.totalorder %s2467_s26, %s2463_s25 }
   0x6   : > { %p177_p1 = scmp.eq.s32.totalorder %s176_s9, 0  ;;  %p190_p2 = scmp.eq.s32.totalorder %s2541_s28, 1 }
   0x7   : > { %p195_p3 = scmp.ne.s32.totalorder %s2463_s25, %s2459_s24  ;;  %p196_p4 = scmp.eq.s32.totalorder %s2172_s29, 1 }
   0x8   : > { %s2556_s10 = scalar_select %p177_p1, %s2467_s26, %s179_s8  }
   0x9   : > { %p2558_p5 = por %p190_p2, %p189_p0  ;;  %p2562_p6 = por %p196_p4, %p195_p3 }
   0xa   : > { %p2175_p7 = scmp.ge.s32.totalorder %s2471_s27, 1  ;;  %p240_p8 = scmp.lt.s32.totalorder %s2471_s27, 3 }
   0xc   : > { %p241_p9 = pnand %p2175_p7, %p240_p8 }
   0xe   : > { %244 = sbr.rel (%p241_p9) target bundleno = 985 (0x3d9), region = 48 }
  0x13   : > { %p272_p10 = scmp.lt.s32.totalorder %s2541_s28, 1  ;;  %v2473_v0 = vmov 1   ;;  %v3591_v1 = vmov 0   ;;  %v3593_v34 = vmov 2   ;;  %v3589_v53 = vmov 3   ;;  %s269_s21 = sand.u32 1, %s2463_s25  }
  0x14   : > { %2371 = vset.pattern.permute.xlu0 %v2473_v0  ;;  %2369 = vset.pattern.permute.xlu2 %v3591_v1  ;;  %vm1446_vm0 = vcmask 261120   ;;  %vm1444_vm1 = vcmask 254976   ;;  %vm1908_vm2 = vcmask 516096   ;;  %vm1910_vm3 = vcmask 523264   ;;  %s2176_s29 = sshll.u32 %s269_s21, 4  ;;  %s2429_s23 = scalar_lea.hbm %s3588_s7, 32 }
  0x15   : > { %2368 = vset.pattern.permute.xlu1 %v3591_v1  ;;  %s273_s13 = scalar_select %p272_p10, %s2541_s28, 1  ;;  %vm2091_vm4 = vcmask 654336  }
  0x17   : > { %s2321_s14 = smul.u32 264, %s273_s13 }
  0x19   : > { %s2576_s17 = scalar_lea.vmem %s3581_s0, %s2321_s14  ;;  %s271_s14 = scalar_lea.vmem [#allocation4], %s2176_s29 }
  0x1a   : > { %v2579_v2 = vld [vmem:[%s2576_s17 + $0x20] sm:$0xff]  ;;  %v2582_v3 = vld [vmem:[%s2576_s17 + $0x10] sm:$0xff]  ;;  %v2585_v4 = vld [vmem:[%s2576_s17 + $0x8] sm:$0xff]  ;;  %s2107_s15 = sshll.u32 %s271_s14, 4  ;;  %s2108_s15 = int_to_ptr.vmem [resolvable:$true] %s2107_s15 }
  0x1b   : > { %333 = vperm.xlu2 %2369, %v2579_v2   ;;  %323 = vperm.xlu1 %2368, %v2582_v3   ;;  %v2591_v5 = vld [vmem:[%s2576_s17 + $0x28] sm:$0xff]  ;;  %v2594_v6 = vld [vmem:[%s2576_s17 + $0x18] sm:$0xff]  ;;  %v2597_v7 = vld [vmem:[%s2576_s17 + $0x30] sm:$0xff] }
  0x1c   : > { %542 = vperm.xlu0 %2371, %v2585_v4   ;;  %v2603_v8 = vld [vmem:[%s2576_s17 + $0x40] sm:$0xff]  ;;  %v2606_v9 = vld [vmem:[%s2576_s17 + $0x38] sm:$0xff]  ;;  %v2609_v10 = vld [vmem:[%s2576_s17 + $0x48] sm:$0xff] }
  0x1d   : > { %v2615_v11 = vld [vmem:[%s2576_s17 + $0x58] sm:$0xff]  ;;  %v2618_v12 = vld [vmem:[%s2576_s17 + $0x50] sm:$0xff]  ;;  %v2621_v13 = vld [vmem:[%s2576_s17 + $0x60] sm:$0xff] }
  0x1e   : > { %v2627_v14 = vld [vmem:[%s2576_s17 + $0x70] sm:$0xff]  ;;  %v2630_v15 = vld [vmem:[%s2576_s17 + $0x68] sm:$0xff]  ;;  %v2633_v16 = vld [vmem:[%s2576_s17 + $0x78] sm:$0xff] }
  0x1f   : > { %v2639_v17 = vld [vmem:[%s2576_s17 + $0x88] sm:$0xff]  ;;  %v2642_v18 = vld [vmem:[%s2576_s17 + $0x80] sm:$0xff]  ;;  %v2645_v19 = vld [vmem:[%s2576_s17 + $0x90] sm:$0xff] }
  0x20   : > { %3601 = vst [vmem:[#allocation7_spill] sm:$0xff] %v2639_v17  ;;  %v2651_v20 = vld [vmem:[%s2576_s17 + $0xa0] sm:$0xff]  ;;  %v2654_v21 = vld [vmem:[%s2576_s17 + $0x98] sm:$0xff]  ;;  %v2657_v22 = vld [vmem:[%s2576_s17 + $0xa8] sm:$0xff] }
  0x21   : > { %3602 = vst [vmem:[#allocation8_spill] sm:$0xff] %v2651_v20  ;;  %v2663_v23 = vld [vmem:[%s2576_s17 + $0xb8] sm:$0xff]  ;;  %v2666_v24 = vld [vmem:[%s2576_s17 + $0xb0] sm:$0xff]  ;;  %v2669_v25 = vld [vmem:[%s2576_s17 + $0xc0] sm:$0xff] }
  0x22   : > { %3603 = vst [vmem:[#allocation9_spill] sm:$0xff] %v2654_v21  ;;  %v2675_v26 = vld [vmem:[%s2576_s17 + $0xd0] sm:$0xff]  ;;  %v2678_v27 = vld [vmem:[%s2576_s17 + $0xc8] sm:$0xff]  ;;  %v2681_v28 = vld [vmem:[%s2576_s17 + $0xd8] sm:$0xff] }
  0x23   : > { %338 = vperm.xlu2 %2369, %v2591_v5   ;;  %328 = vperm.xlu1 %2368, %v2594_v6   ;;  %3604 = vst [vmem:[#allocation10_spill] sm:$0xff] %v2666_v24  ;;  %v2687_v29 = vld [vmem:[%s2576_s17 + $0xe8] sm:$0xff]  ;;  %v2690_v30 = vld [vmem:[%s2576_s17 + $0xe0] sm:$0xff]  ;;  %v2693_v31 = vld [vmem:[%s2576_s17 + $0xf0] sm:$0xff] }
  0x24   : > { %562 = vperm.xlu0 %2371, %v2597_v7   ;;  %v2699_v32 = vld [vmem:[%s2576_s17 + $0xf8] sm:$0xff]  ;;  %v2702_v33 = vld [vmem:[%s2576_s17] sm:$0xff] }
  0x2b   : > { %353 = vperm.xlu2 %2369, %v2603_v8   ;;  %348 = vperm.xlu1 %2368, %v2606_v9  }
  0x2c   : > { %574 = vperm.xlu0 %2371, %v2609_v10  }
  0x33   : > { %368 = vperm.xlu2 %2369, %v2615_v11   ;;  %363 = vperm.xlu1 %2368, %v2618_v12  }
  0x34   : > { %586 = vperm.xlu0 %2371, %v2621_v13  }
  0x3b   : > { %383 = vperm.xlu2 %2369, %v2627_v14   ;;  %378 = vperm.xlu1 %2368, %v2630_v15  }
  0x3c   : > { %598 = vperm.xlu0 %2371, %v2633_v16  }
  0x43   : > { %398 = vperm.xlu2 %2369, %v2639_v17   ;;  %393 = vperm.xlu1 %2368, %v2642_v18  }
  0x44   : > { %610 = vperm.xlu0 %2371, %v2645_v19  }
  0x4b   : > { %413 = vperm.xlu2 %2369, %v2651_v20   ;;  %408 = vperm.xlu1 %2368, %v2654_v21  }
  0x4c   : > { %622 = vperm.xlu0 %2371, %v2657_v22  }
  0x53   : > { %428 = vperm.xlu2 %2369, %v2663_v23   ;;  %423 = vperm.xlu1 %2368, %v2666_v24  }
  0x54   : > { %634 = vperm.xlu0 %2371, %v2669_v25  }
  0x5b   : > { %443 = vperm.xlu2 %2369, %v2675_v26   ;;  %438 = vperm.xlu1 %2368, %v2678_v27  }
  0x5c   : > { %646 = vperm.xlu0 %2371, %v2681_v28  }
  0x63   : > { %458 = vperm.xlu2 %2369, %v2687_v29   ;;  %453 = vperm.xlu1 %2368, %v2690_v30  }
  0x64   : > { %658 = vperm.xlu0 %2371, %v2693_v31  }
  0x6b   : > { %2370 = vset.pattern.permute.xlu2 %v2473_v0  ;;  %468 = vperm.xlu1 %2368, %v2699_v32  }
  0x6c   : > { %2374 = vset.pattern.permute.xlu0 %v3593_v34  ;;  %538 = vperm.xlu2 %2370, %v2702_v33  }
  0x6d   : > { %736 = vperm.xlu0 %2374, %v2585_v4  }
  0x73   : > { %2372 = vset.pattern.permute.xlu1 %v2473_v0 }
  0x74   : > { %546 = vperm.xlu1 %2372, %v2582_v3   ;;  %550 = vperm.xlu2 %2370, %v2594_v6  }
  0x75   : > { %756 = vperm.xlu0 %2374, %v2597_v7   ;;  %v2713_v35 = vpop.permute.xlu2 %333 }
  0x7c   : > { %554 = vperm.xlu1 %2372, %v2579_v2   ;;  %558 = vperm.xlu2 %2370, %v2591_v5  }
  0x7d   : > { %768 = vperm.xlu0 %2374, %v2609_v10   ;;  %v2718_v36 = vpop.permute.xlu2 %338 }
  0x84   : > { %566 = vperm.xlu1 %2372, %v2606_v9   ;;  %570 = vperm.xlu2 %2370, %v2603_v8  }
  0x85   : > { %780 = vperm.xlu0 %2374, %v2621_v13   ;;  %v2723_v37 = vpop.permute.xlu2 %353 }
  0x8c   : > { %578 = vperm.xlu1 %2372, %v2618_v12   ;;  %582 = vperm.xlu2 %2370, %v2615_v11  }
  0x8d   : > { %792 = vperm.xlu0 %2374, %v2633_v16   ;;  %v2728_v38 = vpop.permute.xlu2 %368  ;;  %v2730_v39 = vpop.permute.xlu1 %323 }
  0x8e   : > { %v2732_v40 = vpop.permute.xlu0 %542 }
  0x8f   : > { %3605 = vst [vmem:[#allocation11_spill] sm:$0xff] %v2732_v40 }
  0x94   : > { %590 = vperm.xlu1 %2372, %v2630_v15   ;;  %594 = vperm.xlu2 %2370, %v2627_v14  }
  0x95   : > { %804 = vperm.xlu0 %2374, %v2645_v19   ;;  %v2737_v41 = vpop.permute.xlu2 %383  ;;  %v2739_v42 = vpop.permute.xlu1 %328 }
  0x96   : > { %v2741_v43 = vpop.permute.xlu0 %562 }
  0x97   : > { %3606 = vst [vmem:[#allocation12_spill] sm:$0xff] %v2741_v43 }
  0x9c   : > { %602 = vperm.xlu1 %2372, %v2642_v18   ;;  %606 = vperm.xlu2 %2370, %v2639_v17  }
  0x9d   : > { %816 = vperm.xlu0 %2374, %v2657_v22   ;;  %v2746_v44 = vpop.permute.xlu2 %398  ;;  %v2748_v45 = vpop.permute.xlu1 %348 }
  0x9e   : > { %v2750_v46 = vpop.permute.xlu0 %574 }
  0x9f   : > { %3607 = vst [vmem:[#allocation13_spill] sm:$0xff] %v2750_v46 }
  0xa4   : > { %614 = vperm.xlu1 %2372, %v2654_v21   ;;  %618 = vperm.xlu2 %2370, %v2651_v20  }
  0xa5   : > { %828 = vperm.xlu0 %2374, %v2669_v25   ;;  %v2755_v47 = vpop.permute.xlu2 %413  ;;  %v2757_v48 = vpop.permute.xlu1 %363 }
  0xa6   : > { %v2759_v49 = vpop.permute.xlu0 %586 }
  0xa7   : > { %3608 = vst [vmem:[#allocation14_spill] sm:$0xff] %v2759_v49 }
  0xac   : > { %626 = vperm.xlu1 %2372, %v2666_v24   ;;  %630 = vperm.xlu2 %2370, %v2663_v23  }
  0xad   : > { %848 = vperm.xlu0 %2374, %v2687_v29   ;;  %v2764_v50 = vpop.permute.xlu2 %428  ;;  %v2766_v51 = vpop.permute.xlu1 %378 }
  0xae   : > { %3609 = vst [vmem:[#allocation15_spill] sm:$0xff] %v2764_v50  ;;  %v2768_v52 = vpop.permute.xlu0 %598 }
  0xaf   : > { %3610 = vst [vmem:[#allocation16_spill] sm:$0xff] %v2768_v52 }
  0xb4   : > { %638 = vperm.xlu1 %2372, %v2678_v27   ;;  %642 = vperm.xlu2 %2370, %v2675_v26  }
  0xb5   : > { %2382 = vset.pattern.permute.xlu0 %v3589_v53  ;;  %v2773_v54 = vpop.permute.xlu2 %443  ;;  %v2775_v55 = vpop.permute.xlu1 %393 }
  0xb6   : > { %930 = vperm.xlu0 %2382, %v2585_v4   ;;  %v2778_v56 = vpop.permute.xlu0 %610 }
  0xb7   : > { %3611 = vst [vmem:[#allocation17_spill] sm:$0xff] %v2778_v56 }
  0xbc   : > { %650 = vperm.xlu1 %2372, %v2690_v30   ;;  %654 = vperm.xlu2 %2370, %v2687_v29  }
  0xbd   : > { %v2782_v57 = vpop.permute.xlu2 %458  ;;  %v2784_v58 = vpop.permute.xlu1 %408 }
  0xbe   : > { %950 = vperm.xlu0 %2382, %v2597_v7   ;;  %v2787_v59 = vpop.permute.xlu0 %622 }
  0xbf   : > { %3612 = vst [vmem:[#allocation18_spill] sm:$0xff] %v2787_v59 }
  0xc4   : > { %662 = vperm.xlu1 %2372, %v2699_v32   ;;  %2373 = vset.pattern.permute.xlu2 %v3593_v34 }
  0xc5   : > { %v2791_v60 = vpop.permute.xlu1 %423  ;;  %732 = vperm.xlu2 %2373, %v2702_v33  }
  0xc6   : > { %3613 = vst [vmem:[#allocation19_spill] sm:$0xff] %v2791_v60  ;;  %1018 = vperm.xlu0 %2382, %v2663_v23   ;;  %v2795_v61 = vpop.permute.xlu0 %634  ;;  %v2797_v62 = vpop.permute.xlu2 %538 }
  0xc7   : > { %3614 = vst [vmem:[#allocation20_spill] sm:$0xff] %v2795_v61 }
  0xcc   : > { %2375 = vset.pattern.permute.xlu1 %v3593_v34 }
  0xcd   : > { %740 = vperm.xlu1 %2375, %v2582_v3   ;;  %v2801_v63 = vpop.permute.xlu1 %438  ;;  %744 = vperm.xlu2 %2373, %v2594_v6  }
  0xce   : > { %1038 = vperm.xlu0 %2382, %v2690_v30   ;;  %v2805_v0 = vpop.permute.xlu0 %646  ;;  %v2807_v53 = vpop.permute.xlu2 %550 }
  0xcf   : > { %3615 = vst [vmem:[#allocation21_spill] sm:$0xff] %v2805_v0 }
  0xd5   : > { %748 = vperm.xlu1 %2375, %v2579_v2   ;;  %v2810_v1 = vpop.permute.xlu1 %453  ;;  %752 = vperm.xlu2 %2373, %v2591_v5  }
  0xd6   : > { %1050 = vperm.xlu0 %2382, %v2699_v32   ;;  %v2814_v34 = vpop.permute.xlu0 %658  ;;  %v2816_v61 = vpop.permute.xlu2 %558 }
  0xd7   : > { %3616 = vst [vmem:[#allocation22_spill] sm:$0xff] %v2814_v34 }
  0xdd   : > { %760 = vperm.xlu1 %2375, %v2606_v9   ;;  %v2819_v59 = vpop.permute.xlu1 %468  ;;  %764 = vperm.xlu2 %2373, %v2603_v8  }
  0xde   : > { %990 = vperm.xlu0 %2382, %v2642_v18   ;;  %v2823_v0 = vpop.permute.xlu2 %570 }
  0xdf   : > { %v2825_v56 = vpop.permute.xlu0 %736 }
  0xe0   : > { %3617 = vst [vmem:[#allocation23_spill] sm:$0xff] %v2825_v56 }
  0xe5   : > { %772 = vperm.xlu1 %2375, %v2618_v12   ;;  %776 = vperm.xlu2 %2373, %v2615_v11  }
  0xe6   : > { %1010 = vperm.xlu0 %2382, %v2657_v22   ;;  %v2830_v34 = vpop.permute.xlu1 %546  ;;  %v2832_v52 = vpop.permute.xlu2 %582 }
  0xe7   : > { %v2834_v50 = vpop.permute.xlu0 %756 }
  0xe8   : > { %3618 = vst [vmem:[#allocation24_spill] sm:$0xff] %v2834_v50  ;;  %v3621_v50 = vmov 0  }
  0xed   : > { %784 = vperm.xlu1 %2375, %v2630_v15   ;;  %788 = vperm.xlu2 %2373, %v2627_v14  }
  0xee   : > { %962 = vperm.xlu0 %2382, %v2609_v10   ;;  %v2839_v8 = vpop.permute.xlu1 %554  ;;  %v2841_v49 = vpop.permute.xlu2 %594 }
  0xef   : > { %v2843_v12 = vpop.permute.xlu0 %768 }
  0xf0   : > { %3619 = vst [vmem:[#allocation25_spill] sm:$0xff] %v2843_v12 }
  0xf5   : > { %796 = vperm.xlu1 %2375, %v2642_v18   ;;  %800 = vperm.xlu2 %2373, %v2639_v17  }
  0xf6   : > { %982 = vperm.xlu0 %2382, %v2627_v14   ;;  %v2848_v11 = vpop.permute.xlu1 %566  ;;  %v2850_v46 = vpop.permute.xlu2 %606  ;;  %v3623_v14 = vmov 3  }
  0xf7   : > { %v2852_v15 = vpop.permute.xlu0 %780 }
  0xf8   : > { %3620 = vst [vmem:[#allocation26_spill] sm:$0xff] %v2852_v15 }
  0xfd   : > { %808 = vperm.xlu1 %2375, %v2654_v21   ;;  %812 = vperm.xlu2 %2373, %v2651_v20  }
  0xfe   : > { %2393 = vset.pattern.permute.xlu0 %v3621_v50  ;;  %v2857_v43 = vpop.permute.xlu1 %578  ;;  %v2859_v12 = vpop.permute.xlu2 %618 }
  0xff   : > { %v2861_v18 = vpop.permute.xlu0 %792  ;;  %313 = vperm.xlu0 %2393, %v2702_v33  }
 0x100   : > { %3622 = vst [vmem:[#allocation27_spill] sm:$0xff] %v2861_v18  ;;  %v2877_v18 = vld [vmem:[%s3582_s1] ss:$0 sm:$0xff] }
 0x101   : > { %v501_v40 = vmul.f32 %v2877_v18, %v2782_v57 }
 0x105   : > { %820 = vperm.xlu1 %2375, %v2666_v24   ;;  %2376 = vset.pattern.permute.xlu2 %v3623_v14  ;;  %v2882_v24 = vld [vmem:[%s3582_s1 + $0x1] ss:$0 sm:$0xff] }
 0x106   : > { %v2866_v17 = vpop.permute.xlu1 %590  ;;  %926 = vperm.xlu2 %2376, %v2702_v33   ;;  %v2869_v21 = vpop.permute.xlu2 %630 }
 0x107   : > { %3624 = vst [vmem:[#allocation28_spill] sm:$0xff] %v2869_v21  ;;  %v2871_v20 = vpop.permute.xlu0 %804  ;;  %318 = vperm.xlu0 %2393, %v2585_v4   ;;  %v498_v4 = vmul.f32 %v2877_v18, %v2773_v54 }
 0x108   : > { %3625 = vst [vmem:[#allocation29_spill] sm:$0xff] %v2871_v20 }
 0x10d   : > { %2377 = vset.pattern.permute.xlu1 %v3623_v14 }
 0x10e   : > { %934 = vperm.xlu1 %2377, %v2582_v3   ;;  %v2886_v33 = vpop.permute.xlu1 %602  ;;  %938 = vperm.xlu2 %2376, %v2594_v6   ;;  %v643_v20 = vpop.permute.xlu2 %642 }
 0x10f   : > { %v2891_v15 = vpop.permute.xlu0 %816  ;;  %343 = vperm.xlu0 %2393, %v2597_v7   ;;  %v692_v21 = vmul.f32 %v2882_v24, %v643_v20 }
 0x110   : > { %3626 = vst [vmem:[#allocation30_spill] sm:$0xff] %v2891_v15  ;;  %v671_v15 = vmul.f32 %v2882_v24, %v2816_v61 }
 0x111   : > { %v2895_v56 = vadd.f32 %v692_v21, %v498_v4  ;;  %v1118_v21 = vld [vmem:[%s2576_s17 + $0x1] sm:$0xff]  ;;  %v669_v4 = vmul.f32 %v2882_v24, %v2807_v53 }
 0x113   : > { %3627 = vst [vmem:[#allocation31_spill] sm:$0xff] %v2895_v56 }
 0x116   : > { %942 = vperm.xlu1 %2377, %v2579_v2   ;;  %v2898_v3 = vpop.permute.xlu1 %614  ;;  %946 = vperm.xlu2 %2376, %v2591_v5   ;;  %v655_v6 = vpop.permute.xlu2 %654  ;;  %v2910_v2 = vld [vmem:[%s3582_s1 + $0x2] ss:$0 sm:$0xff] }
 0x117   : > { %v2903_v60 = vpop.permute.xlu0 %828  ;;  %358 = vperm.xlu0 %2393, %v2609_v10   ;;  %v695_v7 = vmul.f32 %v2882_v24, %v655_v6  ;;  %v1120_v6 = vld [vmem:[%s2576_s17 + $0x11] sm:$0xff] }
 0x118   : > { %3628 = vst [vmem:[#allocation32_spill] sm:$0xff] %v2903_v60 }
 0x119   : > { %v727_v20 = vadd.f32 %v695_v7, %v501_v40  ;;  %v1121_v7 = vld [vmem:[%s2576_s17 + $0x19] sm:$0xff] }
 0x11e   : > { %954 = vperm.xlu1 %2377, %v2606_v9   ;;  %v2914_v5 = vpop.permute.xlu1 %626  ;;  %2378 = vset.pattern.permute.xlu2 %v3621_v50  ;;  %v475_v9 = vmul.f32 %v2877_v18, %v2739_v42 }
 0x11f   : > { %v849_v54 = vpop.permute.xlu0 %848  ;;  %373 = vperm.xlu0 %2393, %v2621_v13   ;;  %1153 = vperm.xlu2 %2378, %v1118_v21   ;;  %v2918_v10 = vpop.permute.xlu2 %732  ;;  %v497_v21 = vmul.f32 %v2877_v18, %v2801_v63  ;;  %v1122_v63 = vld [vmem:[%s2576_s17 + $0x21] sm:$0xff] }
 0x120   : > { %v889_v40 = vmul.f32 %v2910_v2, %v849_v54  ;;  %v701_v53 = vadd.f32 %v669_v4, %v475_v9  ;;  %v500_v4 = vmul.f32 %v2877_v18, %v2810_v1  ;;  %v1125_v1 = vld [vmem:[%s2576_s17 + $0x39] sm:$0xff] }
 0x122   : > { %v2921_v57 = vadd.f32 %v889_v40, %v727_v20 }
 0x124   : > { %3629 = vst [vmem:[#allocation33_spill] sm:$0xff] %v2921_v57 }
 0x126   : > { %2379 = vset.pattern.permute.xlu1 %v3621_v50  ;;  %v639_v13 = vpop.permute.xlu1 %638 }
 0x127   : > { %v691_v54 = vmul.f32 %v2882_v24, %v639_v13  ;;  %388 = vperm.xlu0 %2393, %v2633_v16   ;;  %1163 = vperm.xlu1 %2379, %v1120_v6   ;;  %v745_v20 = vpop.permute.xlu2 %744  ;;  %v1123_v13 = vld [vmem:[%s2576_s17 + $0x29] sm:$0xff]  ;;  %v477_v6 = vmul.f32 %v2877_v18, %v2718_v36  ;;  %v674_v36 = vmul.f32 %v2882_v24, %v2823_v0 }
 0x128   : > { %v2934_v40 = vpop.permute.xlu0 %930  ;;  %1168 = vperm.xlu2 %2378, %v1121_v7   ;;  %v863_v57 = vmul.f32 %v2910_v2, %v745_v20 }
 0x129   : > { %v2937_v42 = vadd.f32 %v691_v54, %v497_v21  ;;  %v703_v9 = vadd.f32 %v671_v15, %v477_v6  ;;  %v503_v15 = vmul.f32 %v2877_v18, %v2819_v59  ;;  %v668_v59 = vmul.f32 %v2882_v24, %v2830_v34 }
 0x12a   : > { %v2939_v60 = vadd.f32 %v863_v57, %v701_v53 }
 0x12e   : > { %v651_v56 = vpop.permute.xlu1 %650 }
 0x12f   : > { %v694_v7 = vmul.f32 %v2882_v24, %v651_v56  ;;  %403 = vperm.xlu0 %2393, %v2645_v19   ;;  %1173 = vperm.xlu1 %2379, %v1122_v63   ;;  %v753_v57 = vpop.permute.xlu2 %752  ;;  %v480_v56 = vmul.f32 %v2877_v18, %v2723_v37 }
 0x130   : > { %v2951_v21 = vpop.permute.xlu0 %950  ;;  %1178 = vperm.xlu2 %2378, %v1123_v13   ;;  %v865_v61 = vmul.f32 %v2910_v2, %v753_v57 }
 0x131   : > { %v2954_v54 = vadd.f32 %v694_v7, %v500_v4  ;;  %v706_v6 = vadd.f32 %v674_v36, %v480_v56  ;;  %v3630_v7 = vmov 2  }
 0x132   : > { %v2956_v20 = vadd.f32 %v865_v61, %v703_v9  ;;  %v483_v9 = vmul.f32 %v2877_v18, %v2728_v38  ;;  %v474_v61 = vmul.f32 %v2877_v18, %v2730_v39 }
 0x136   : > { %v663_v53 = vpop.permute.xlu1 %662 }
 0x137   : > { %v697_v63 = vmul.f32 %v2882_v24, %v663_v53  ;;  %418 = vperm.xlu0 %2393, %v2657_v22   ;;  %1188 = vperm.xlu1 %2379, %v1125_v1   ;;  %v765_v13 = vpop.permute.xlu2 %764  ;;  %v677_v22 = vmul.f32 %v2882_v24, %v2832_v52  ;;  %v700_v1 = vadd.f32 %v668_v59, %v474_v61 }
 0x138   : > { %v2967_v4 = vpop.permute.xlu0 %1018  ;;  %2380 = vset.pattern.permute.xlu2 %v3630_v7  ;;  %v868_v0 = vmul.f32 %v2910_v2, %v765_v13  ;;  %v476_v13 = vmul.f32 %v2877_v18, %v2713_v35 }
 0x139   : > { %v2971_v57 = vadd.f32 %v697_v63, %v503_v15  ;;  %824 = vperm.xlu2 %2380, %v2663_v23   ;;  %v709_v56 = vadd.f32 %v677_v22, %v483_v9  ;;  %v670_v15 = vmul.f32 %v2882_v24, %v2839_v8  ;;  %v680_v63 = vmul.f32 %v2882_v24, %v2841_v49 }
 0x13a   : > { %v2974_v37 = vadd.f32 %v868_v0, %v706_v6  ;;  %v486_v6 = vmul.f32 %v2877_v18, %v2737_v41  ;;  %v673_v41 = vmul.f32 %v2882_v24, %v2848_v11 }
 0x13b   : > { %v702_v59 = vadd.f32 %v670_v15, %v476_v13  ;;  %v686_v13 = vmul.f32 %v2882_v24, %v2859_v12  ;;  %v679_v12 = vmul.f32 %v2882_v24, %v2866_v17  ;;  %v682_v17 = vmul.f32 %v2882_v24, %v2886_v33 }
 0x13c   : > { %v712_v22 = vadd.f32 %v680_v63, %v486_v6  ;;  %v1119_v6 = vld [vmem:[%s2576_s17 + $0x9] sm:$0xff] }
 0x13f   : > { %433 = vperm.xlu0 %2393, %v2669_v25   ;;  %2381 = vset.pattern.permute.xlu1 %v3630_v7  ;;  %v741_v36 = vpop.permute.xlu1 %740  ;;  %v777_v23 = vpop.permute.xlu2 %776 }
 0x140   : > { %v862_v53 = vmul.f32 %v2910_v2, %v741_v36  ;;  %v2987_v34 = vpop.permute.xlu0 %1038  ;;  %v871_v52 = vmul.f32 %v2910_v2, %v777_v23  ;;  %832 = vperm.xlu1 %2381, %v2678_v27   ;;  %v683_v36 = vmul.f32 %v2882_v24, %v2850_v46  ;;  %v489_v23 = vmul.f32 %v2877_v18, %v2746_v44 }
 0x141   : > { %836 = vperm.xlu2 %2380, %v2675_v26  }
 0x142   : > { %v2992_v38 = vadd.f32 %v862_v53, %v700_v1  ;;  %v2994_v39 = vadd.f32 %v871_v52, %v709_v56  ;;  %v479_v1 = vmul.f32 %v2877_v18, %v2748_v45  ;;  %v715_v52 = vadd.f32 %v683_v36, %v489_v23  ;;  %v1124_v36 = vld [vmem:[%s2576_s17 + $0x31] sm:$0xff] }
 0x143   : > { %v676_v45 = vmul.f32 %v2882_v24, %v2857_v43  ;;  %v485_v23 = vmul.f32 %v2877_v18, %v2766_v51  ;;  %v3071_v51 = vld [vmem:[%s3582_s1 + $0x3] ss:$0 sm:$0xff] }
 0x144   : > { %v705_v53 = vadd.f32 %v673_v41, %v479_v1 }
 0x147   : > { %448 = vperm.xlu0 %2393, %v2681_v28   ;;  %v749_v7 = vpop.permute.xlu1 %748  ;;  %v789_v0 = vpop.permute.xlu2 %788 }
 0x148   : > { %v864_v9 = vmul.f32 %v2910_v2, %v749_v7  ;;  %v3006_v61 = vpop.permute.xlu0 %1050  ;;  %v874_v8 = vmul.f32 %v2910_v2, %v789_v0  ;;  %840 = vperm.xlu1 %2381, %v2681_v28   ;;  %v492_v7 = vmul.f32 %v2877_v18, %v2755_v47  ;;  %v482_v0 = vmul.f32 %v2877_v18, %v2757_v48 }
 0x149   : > { %844 = vperm.xlu2 %2380, %v2690_v30  }
 0x14a   : > { %v3011_v35 = vadd.f32 %v864_v9, %v702_v59  ;;  %v3013_v49 = vadd.f32 %v874_v8, %v712_v22  ;;  %v708_v22 = vadd.f32 %v676_v45, %v482_v0  ;;  %v718_v9 = vadd.f32 %v686_v13, %v492_v7 }
 0x14b   : > { %v685_v0 = vmul.f32 %v2882_v24, %v2898_v3  ;;  %v666_v3 = vmul.f32 %v2882_v24, %v2797_v62 }
 0x14f   : > { %463 = vperm.xlu0 %2393, %v2693_v31   ;;  %v761_v30 = vpop.permute.xlu1 %760  ;;  %v801_v56 = vpop.permute.xlu2 %800 }
 0x150   : > { %v867_v15 = vmul.f32 %v2910_v2, %v761_v30  ;;  %v991_v63 = vpop.permute.xlu0 %990  ;;  %v877_v11 = vmul.f32 %v2910_v2, %v801_v56  ;;  %852 = vperm.xlu1 %2381, %v2693_v31   ;;  %v711_v30 = vadd.f32 %v679_v12, %v485_v23  ;;  %v860_v23 = vmul.f32 %v2910_v2, %v2918_v10  ;;  %v1145_v10 = vld [vmem:[%s2576_s17 + $0xd9] sm:$0xff] }
 0x151   : > { %856 = vperm.xlu2 %2380, %v2699_v32   ;;  %v1070_v45 = vmul.f32 %v3071_v51, %v991_v63 }
 0x152   : > { %v3028_v44 = vadd.f32 %v867_v15, %v705_v53  ;;  %v3030_v46 = vadd.f32 %v877_v11, %v715_v52  ;;  %v488_v15 = vmul.f32 %v2877_v18, %v2775_v55 }
 0x157   : > { %1158 = vperm.xlu0 %2393, %v1119_v6   ;;  %v773_v32 = vpop.permute.xlu1 %772  ;;  %v813_v59 = vpop.permute.xlu2 %812 }
 0x158   : > { %v870_v8 = vmul.f32 %v2910_v2, %v773_v32  ;;  %v3042_v41 = vpop.permute.xlu0 %1010  ;;  %v880_v43 = vmul.f32 %v2910_v2, %v813_v59  ;;  %2383 = vset.pattern.permute.xlu1 %v3623_v14  ;;  %v1148_v32 = vld [vmem:[%s2576_s17 + $0xf1] sm:$0xff]  ;;  %v491_v59 = vmul.f32 %v2877_v18, %v2784_v58 }
 0x159   : > { %2384 = vset.pattern.permute.xlu2 %v3623_v14  ;;  %1022 = vperm.xlu1 %2383, %v2669_v25  }
 0x15a   : > { %v3048_v47 = vadd.f32 %v870_v8, %v708_v22  ;;  %v3050_v48 = vadd.f32 %v880_v43, %v718_v9  ;;  %1026 = vperm.xlu2 %2384, %v2678_v27   ;;  %v1143_v27 = vld [vmem:[%s2576_s17 + $0xc9] sm:$0xff]  ;;  %v1141_v9 = vld [vmem:[%s2576_s17 + $0xb9] sm:$0xff] }
 0x15f   : > { %1183 = vperm.xlu0 %2393, %v1124_v36   ;;  %v785_v1 = vpop.permute.xlu1 %784  ;;  %v688_v36 = vmul.f32 %v2882_v24, %v2914_v5 }
 0x160   : > { %v873_v56 = vmul.f32 %v2910_v2, %v785_v1  ;;  %v3059_v25 = vpop.permute.xlu0 %962  ;;  %v927_v53 = vpop.permute.xlu2 %926 }
 0x161   : > { %1030 = vperm.xlu1 %2383, %v2675_v26   ;;  %v714_v26 = vadd.f32 %v682_v17, %v488_v15  ;;  %v1054_v17 = vmul.f32 %v3071_v51, %v927_v53  ;;  %v3113_v15 = vld [vmem:[%s3582_s1 + $0x4] ss:$0 sm:$0xff] }
 0x162   : > { %v3062_v52 = vadd.f32 %v873_v56, %v711_v30  ;;  %1034 = vperm.xlu2 %2384, %v2681_v28   ;;  %v1134_v30 = vld [vmem:[%s2576_s17 + $0x81] sm:$0xff]  ;;  %v3631_v56 = vld [vmem:[#allocation19_spill] sm:$0xff] }
 0x163   : > { %v494_v62 = vmul.f32 %v2877_v18, %v3631_v56 }
 0x165   : > { %v720_v5 = vadd.f32 %v688_v36, %v494_v62  ;;  %v1147_v62 = vld [vmem:[%s2576_s17 + $0xe9] sm:$0xff] }
 0x167   : > { %1278 = vperm.xlu0 %2393, %v1143_v27   ;;  %v797_v11 = vpop.permute.xlu1 %796 }
 0x168   : > { %v876_v28 = vmul.f32 %v2910_v2, %v797_v11  ;;  %v983_v13 = vpop.permute.xlu0 %982  ;;  %v939_v33 = vpop.permute.xlu2 %938 }
 0x169   : > { %v1068_v6 = vmul.f32 %v3071_v51, %v983_v13  ;;  %1042 = vperm.xlu1 %2383, %v2687_v29   ;;  %v717_v29 = vadd.f32 %v685_v0, %v491_v59  ;;  %v3126_v59 = vld [vmem:[%s3583_s2] ss:$0 sm:$0xff] }
 0x16a   : > { %v908_v7 = vadd.f32 %v876_v28, %v714_v26  ;;  %1046 = vperm.xlu2 %2384, %v2693_v31   ;;  %v1144_v26 = vld [vmem:[%s2576_s17 + $0xd1] sm:$0xff] }
 0x16b   : > { %v3081_v55 = vadd.f32 %v1068_v6, %v3013_v49  ;;  %v1142_v49 = vld [vmem:[%s2576_s17 + $0xc1] sm:$0xff]  ;;  %v3632_v28 = vld [vmem:[#allocation11_spill] sm:$0xff] }
 0x16c   : > { %v3086_v63 = vadd.f32 %v1070_v45, %v908_v7  ;;  %v667_v13 = vmul.f32 %v2882_v24, %v3632_v28 }
 0x16f   : > { %1303 = vperm.xlu0 %2393, %v1148_v32   ;;  %v809_v22 = vpop.permute.xlu1 %808 }
 0x170   : > { %v879_v8 = vmul.f32 %v2910_v2, %v809_v22  ;;  %v3092_v31 = vpop.permute.xlu2 %946 }
 0x171   : > { %v314_v43 = vpop.permute.xlu0 %313  ;;  %2385 = vset.pattern.permute.xlu1 %v3621_v50 }
 0x172   : > { %v3098_v12 = vadd.f32 %v879_v8, %v717_v29  ;;  %v472_v58 = vmul.f32 %v2877_v18, %v314_v43  ;;  %2386 = vset.pattern.permute.xlu2 %v3621_v50  ;;  %1268 = vperm.xlu1 %2385, %v1141_v9   ;;  %v3633_v9 = vld [vmem:[#allocation23_spill] sm:$0xff]  ;;  %v1055_v8 = vmul.f32 %v3071_v51, %v2934_v40 }
 0x173   : > { %1273 = vperm.xlu2 %2386, %v1142_v49   ;;  %v861_v29 = vmul.f32 %v2910_v2, %v3633_v9 }
 0x174   : > { %v698_v1 = vadd.f32 %v666_v3, %v472_v58  ;;  %v1139_v3 = vld [vmem:[%s2576_s17 + $0xa9] sm:$0xff] }
 0x176   : > { %v892_v27 = vadd.f32 %v860_v23, %v698_v1  ;;  %v1057_v23 = vmul.f32 %v3071_v51, %v939_v33  ;;  %v1146_v1 = vld [vmem:[%s2576_s17 + $0xe1] sm:$0xff] }
 0x177   : > { %1233 = vperm.xlu0 %2393, %v1134_v30   ;;  %v821_v11 = vpop.permute.xlu1 %820 }
 0x178   : > { %v882_v45 = vmul.f32 %v2910_v2, %v821_v11  ;;  %v1086_v32 = vadd.f32 %v1054_v17, %v892_v27  ;;  %v3634_v11 = vld [vmem:[#allocation12_spill] sm:$0xff]  ;;  %v1089_v33 = vadd.f32 %v1057_v23, %v2939_v60 }
 0x179   : > { %v319_v6 = vpop.permute.xlu0 %318  ;;  %v1154_v7 = vpop.permute.xlu2 %1153  ;;  %v672_v40 = vmul.f32 %v2882_v24, %v3634_v11  ;;  %v1149_v60 = vld [vmem:[%s2576_s17 + $0xf9] sm:$0xff]  ;;  %v1063_v11 = vmul.f32 %v3071_v51, %v3059_v25 }
 0x17a   : > { %v3120_v53 = vadd.f32 %v882_v45, %v720_v5  ;;  %v473_v0 = vmul.f32 %v2877_v18, %v319_v6  ;;  %v1312_v22 = vmul.f32 %v3113_v15, %v1154_v7  ;;  %1283 = vperm.xlu1 %2385, %v1144_v26   ;;  %v1128_v7 = vld [vmem:[%s2576_s17 + $0x51] sm:$0xff] }
 0x17b   : > { %1288 = vperm.xlu2 %2386, %v1145_v10   ;;  %v3635_v10 = vld [vmem:[#allocation24_spill] sm:$0xff] }
 0x17c   : > { %v699_v49 = vadd.f32 %v667_v13, %v473_v0  ;;  %v1344_v43 = vadd.f32 %v1312_v22, %v1086_v32  ;;  %v866_v28 = vmul.f32 %v2910_v2, %v3635_v10  ;;  %v1060_v13 = vmul.f32 %v3071_v51, %v2951_v21 }
 0x17d   : > { %v1059_v22 = vmul.f32 %v3071_v51, %v3092_v31 }
 0x17e   : > { %v893_v58 = vadd.f32 %v861_v29, %v699_v49  ;;  %v1380_v36 = vadd.f32 %v3126_v59, %v1344_v43 }
 0x17f   : > { %1258 = vperm.xlu0 %2393, %v1139_v3   ;;  %v3636_v3 = vld [vmem:[#allocation13_spill] sm:$0xff]  ;;  %v1091_v23 = vadd.f32 %v1059_v22, %v2956_v20  ;;  %v3638_v20 = vld [vmem:[#allocation28_spill] sm:$0xff]  ;;  %v3642_v22 = vld [vmem:[#allocation26_spill] sm:$0xff] }
 0x180   : > { %v1412_v30 = vmax.f32 %v1380_v36, 0.0  ;;  %v935_v56 = vpop.permute.xlu1 %934  ;;  %v3138_v17 = vadd.f32 %v1055_v8, %v893_v58  ;;  %v675_v58 = vmul.f32 %v2882_v24, %v3636_v3  ;;  %v1077_v3 = vmul.f32 %v3071_v51, %v2967_v4  ;;  %v3644_v4 = vld [vmem:[#allocation9_spill] sm:$0xff] }
 0x181   : > { %v344_v27 = vpop.permute.xlu0 %343 }
 0x182   : > { %1447 = vst.msk [vmem:[#allocation2 + $0x8] sm:$0xff] %vm1446_vm0, %v1412_v30  ;;  %v478_v26 = vmul.f32 %v2877_v18, %v344_v27  ;;  %v1169_v5 = vpop.permute.xlu2 %1168  ;;  %1293 = vperm.xlu1 %2385, %v1146_v1   ;;  %v3637_v1 = vld [vmem:[#allocation25_spill] sm:$0xff] }
 0x183   : > { %v1315_v45 = vmul.f32 %v3113_v15, %v1169_v5  ;;  %1298 = vperm.xlu2 %2386, %v1147_v62   ;;  %v869_v30 = vmul.f32 %v2910_v2, %v3637_v1  ;;  %v689_v5 = vmul.f32 %v2882_v24, %v3638_v20 }
 0x184   : > { %v704_v6 = vadd.f32 %v672_v40, %v478_v26 }
 0x185   : > { %v1347_v0 = vadd.f32 %v1315_v45, %v1089_v33 }
 0x186   : > { %v898_v32 = vadd.f32 %v866_v28, %v704_v6 }
 0x187   : > { %v1383_v9 = vadd.f32 %v3126_v59, %v1347_v0  ;;  %1203 = vperm.xlu0 %2393, %v1128_v7   ;;  %v3640_v7 = vld [vmem:[#allocation15_spill] sm:$0xff] }
 0x188   : > { %v943_v29 = vpop.permute.xlu1 %942  ;;  %v3155_v8 = vadd.f32 %v1060_v13, %v898_v32  ;;  %v3639_v13 = vld [vmem:[#allocation14_spill] sm:$0xff]  ;;  %v3641_v32 = vld [vmem:[#allocation7_spill] sm:$0xff] }
 0x189   : > { %v1415_v49 = vmax.f32 %v1383_v9, 0.0  ;;  %v359_v43 = vpop.permute.xlu0 %358  ;;  %v678_v6 = vmul.f32 %v2882_v24, %v3639_v13  ;;  %v872_v9 = vmul.f32 %v2910_v2, %v3642_v22  ;;  %v1058_v13 = vmul.f32 %v3071_v51, %v943_v29  ;;  %v3648_v22 = vld [vmem:[#allocation17_spill] sm:$0xff] }
 0x18a   : > { %v481_v21 = vmul.f32 %v2877_v18, %v359_v43  ;;  %v1179_v36 = vpop.permute.xlu2 %1178  ;;  %1308 = vperm.xlu1 %2385, %v1149_v60  }
 0x18b   : > { %1450 = vst.msk [vmem:[#allocation2 + $0x20] sm:$0xff] %vm1446_vm0, %v1415_v49  ;;  %v1317_v31 = vmul.f32 %v3113_v15, %v1179_v36  ;;  %2387 = vset.pattern.permute.xlu2 %v3623_v14 }
 0x18c   : > { %v707_v62 = vadd.f32 %v675_v58, %v481_v21  ;;  %986 = vperm.xlu2 %2387, %v2633_v16   ;;  %v495_v16 = vmul.f32 %v2877_v18, %v3640_v7  ;;  %v1056_v58 = vmul.f32 %v3071_v51, %v935_v56  ;;  %v3645_v56 = vld [vmem:[#allocation27_spill] sm:$0xff] }
 0x18d   : > { %v1349_v27 = vadd.f32 %v1317_v31, %v1091_v23 }
 0x18e   : > { %v901_v40 = vadd.f32 %v869_v30, %v707_v62  ;;  %v721_v60 = vadd.f32 %v689_v5, %v495_v16  ;;  %v3643_v30 = vld [vmem:[#allocation16_spill] sm:$0xff] }
 0x18f   : > { %v1385_v26 = vadd.f32 %v3126_v59, %v1349_v27  ;;  %v681_v62 = vmul.f32 %v2882_v24, %v3643_v30  ;;  %v1088_v27 = vadd.f32 %v1056_v58, %v2992_v38  ;;  %v3649_v58 = vld [vmem:[#allocation10_spill] sm:$0xff] }
 0x190   : > { %v955_v33 = vpop.permute.xlu1 %954  ;;  %v3172_v45 = vadd.f32 %v1063_v11, %v901_v40 }
 0x191   : > { %v1417_v10 = vmax.f32 %v1385_v26, 0.0  ;;  %v374_v28 = vpop.permute.xlu0 %373  ;;  %v875_v26 = vmul.f32 %v2910_v2, %v3645_v56 }
 0x192   : > { %v484_v0 = vmul.f32 %v2877_v18, %v374_v28  ;;  %2388 = vset.pattern.permute.xlu1 %v3623_v14  ;;  %v3646_v28 = vld [vmem:[#allocation8_spill] sm:$0xff] }
 0x193   : > { %1452 = vst.msk [vmem:[#allocation2 + $0x30] sm:$0xff] %vm1446_vm0, %v1417_v10  ;;  %v825_v25 = vpop.permute.xlu2 %824  ;;  %994 = vperm.xlu1 %2388, %v3641_v32  }
 0x194   : > { %v710_v49 = vadd.f32 %v678_v6, %v484_v0  ;;  %v883_v43 = vmul.f32 %v2910_v2, %v825_v25  ;;  %998 = vperm.xlu2 %2387, %v2645_v19   ;;  %v3647_v6 = vld [vmem:[#allocation31_spill] sm:$0xff] }
 0x196   : > { %v915_v21 = vadd.f32 %v883_v43, %v721_v60  ;;  %v3189_v36 = vadd.f32 %v872_v9, %v710_v49  ;;  %v684_v9 = vmul.f32 %v2882_v24, %v3648_v22  ;;  %v1090_v60 = vadd.f32 %v1058_v13, %v3011_v35  ;;  %v1133_v43 = vld [vmem:[%s2576_s17 + $0x79] sm:$0xff] }
 0x197   : > { %v1082_v35 = vmul.f32 %v3071_v51, %v2987_v34 }
 0x198   : > { %v3191_v23 = vadd.f32 %v1077_v3, %v915_v21  ;;  %v3650_v21 = vld [vmem:[#allocation29_spill] sm:$0xff] }
 0x199   : > { %v389_v31 = vpop.permute.xlu0 %388  ;;  %v1164_v1 = vpop.permute.xlu1 %1163 }
 0x19a   : > { %v487_v11 = vmul.f32 %v2877_v18, %v389_v31  ;;  %v1314_v19 = vmul.f32 %v3113_v15, %v1164_v1  ;;  %v878_v31 = vmul.f32 %v2910_v2, %v3650_v21 }
 0x19b   : > { %v837_v40 = vpop.permute.xlu2 %836  ;;  %1002 = vperm.xlu1 %2388, %v3644_v4  }
 0x19c   : > { %v713_v20 = vadd.f32 %v681_v62, %v487_v11  ;;  %v1346_v5 = vadd.f32 %v1314_v19, %v1088_v27  ;;  %v886_v10 = vmul.f32 %v2910_v2, %v837_v40  ;;  %1006 = vperm.xlu2 %2387, %v3646_v28   ;;  %v1061_v27 = vmul.f32 %v3071_v51, %v955_v33 }
 0x19e   : > { %v1382_v38 = vadd.f32 %v3126_v59, %v1346_v5  ;;  %v3206_v7 = vadd.f32 %v886_v10, %v3647_v6  ;;  %v3208_v16 = vadd.f32 %v875_v26, %v713_v20  ;;  %v1135_v5 = vld [vmem:[%s2576_s17 + $0x89] sm:$0xff]  ;;  %v1093_v34 = vadd.f32 %v1061_v27, %v3028_v44 }
 0x19f   : > { %v3651_v10 = vld [vmem:[#allocation18_spill] sm:$0xff]  ;;  %v1085_v44 = vmul.f32 %v3071_v51, %v3006_v61  ;;  %v3653_v61 = vld [vmem:[#allocation20_spill] sm:$0xff] }
 0x1a0   : > { %v1414_v0 = vmax.f32 %v1382_v38, 0.0  ;;  %v687_v28 = vmul.f32 %v2882_v24, %v3651_v10  ;;  %v3652_v6 = vld [vmem:[#allocation30_spill] sm:$0xff]  ;;  %v2297_v10 = vld [vmem:[%s3584_s3 + $0x18] sm:$0xff] }
 0x1a1   : > { %v404_v25 = vpop.permute.xlu0 %403  ;;  %v1174_v32 = vpop.permute.xlu1 %1173  ;;  %1557 = vmatpush.bf16.msra.mxu0 %v2297_v10  ;;  %2318 = vmatpush.bf16.msra.mxu2 %v2297_v10 }
 0x1a2   : > { %1449 = vst.msk [vmem:[#allocation2 + $0x18] sm:$0xff] %vm1446_vm0, %v1414_v0  ;;  %v490_v49 = vmul.f32 %v2877_v18, %v404_v25  ;;  %v1316_v29 = vmul.f32 %v3113_v15, %v1174_v32  ;;  %v881_v0 = vmul.f32 %v2910_v2, %v3652_v6  ;;  %2317 = vmatpush.bf16.msra.mxu1 %v2297_v10 }
 0x1a3   : > { %v845_v3 = vpop.permute.xlu2 %844  ;;  %1014 = vperm.xlu1 %2388, %v3649_v58  }
 0x1a4   : > { %v716_v1 = vadd.f32 %v684_v9, %v490_v49  ;;  %v1348_v30 = vadd.f32 %v1316_v29, %v1090_v60  ;;  %v888_v62 = vmul.f32 %v2910_v2, %v845_v3  ;;  %2389 = vset.pattern.permute.xlu2 %v3621_v50  ;;  %v1075_v9 = vmul.f32 %v3071_v51, %v3042_v41 }
 0x1a5   : > { %1228 = vperm.xlu2 %2389, %v1133_v43  }
 0x1a6   : > { %v1384_v11 = vadd.f32 %v3126_v59, %v1348_v30  ;;  %v920_v19 = vadd.f32 %v888_v62, %v2954_v54  ;;  %v3227_v40 = vadd.f32 %v878_v31, %v716_v1  ;;  %v1136_v54 = vld [vmem:[%s2576_s17 + $0x91] sm:$0xff]  ;;  %v1137_v31 = vld [vmem:[%s2576_s17 + $0x99] sm:$0xff]  ;;  %v690_v1 = vmul.f32 %v2882_v24, %v3653_v61  ;;  %v1138_v62 = vld [vmem:[%s2576_s17 + $0xa1] sm:$0xff] }
 0x1a7   : > { %v2407_v61 = vld [vmem:[%s2576_s17 + $0x60] sm:$0xff] }
 0x1a8   : > { %v1416_v4 = vmax.f32 %v1384_v11, 0.0  ;;  %v3229_v56 = vadd.f32 %v1082_v35, %v920_v19  ;;  %v2477_v35 = vmov 0.0  }
 0x1a9   : > { %v419_v26 = vpop.permute.xlu0 %418  ;;  %v1189_v20 = vpop.permute.xlu1 %1188  ;;  %1445 = vst.msk [vmem:[#allocation2 + $0x6] sm:$0x3] %vm1444_vm1, %v2477_v35 }
 0x1aa   : > { %1451 = vst.msk [vmem:[#allocation2 + $0x28] sm:$0xff] %vm1446_vm0, %v1416_v4  ;;  %v493_v33 = vmul.f32 %v2877_v18, %v419_v26  ;;  %v1319_v13 = vmul.f32 %v3113_v15, %v1189_v20  ;;  %v1140_v20 = vld [vmem:[%s2576_s17 + $0xb1] sm:$0xff] }
 0x1ab   : > { %v857_v38 = vpop.permute.xlu2 %856  ;;  %2390 = vset.pattern.permute.xlu1 %v3621_v50  ;;  %1909 = vst.msk [vmem:[#allocation3 + $0x7] sm:$0x1] %vm1908_vm2, %v2477_v35  ;;  %v2408_v35 = vld [vmem:[%s2576_s17 + $0x68] sm:$0xff] }
 0x1ac   : > { %v719_v25 = vadd.f32 %v687_v28, %v493_v33  ;;  %v1351_v32 = vadd.f32 %v1319_v13, %v1093_v34  ;;  %v891_v22 = vmul.f32 %v2910_v2, %v857_v38  ;;  %1238 = vperm.xlu1 %2390, %v1135_v5   ;;  %v2301_v28 = vld [vmem:[%s3584_s3 + $0x38] sm:$0xff]  ;;  %v2404_v33 = vld [vmem:[%s2576_s17 + $0x40] sm:$0xff]  ;;  %v2296_v13 = vld [vmem:[%s3584_s3 + $0x10] sm:$0xff] }
 0x1ad   : > { %1243 = vperm.xlu2 %2389, %v1136_v54   ;;  %1772 = vmatpush.bf16.msra.mxu3 %v2301_v28  ;;  %v2300_v54 = vld [vmem:[%s3584_s3 + $0x30] sm:$0xff] }
 0x1ae   : > { %v913_v60 = vadd.f32 %v881_v0, %v719_v25  ;;  %v1387_v49 = vadd.f32 %v3126_v59, %v1351_v32  ;;  %v923_v29 = vadd.f32 %v891_v22, %v2971_v57  ;;  %v3654_v57 = vld [vmem:[#allocation32_spill] sm:$0xff]  ;;  %1558 = vmatpush.bf16.msra.mxu0 %v2296_v13  ;;  %2320 = vmatpush.bf16.msra.mxu2 %v2296_v13  ;;  %v2405_v25 = vld [vmem:[%s2576_s17 + $0x50] sm:$0xff] }
 0x1af   : > { %v884_v27 = vmul.f32 %v2910_v2, %v3654_v57  ;;  %2319 = vmatpush.bf16.msra.mxu1 %v2296_v13  ;;  %v2406_v32 = vld [vmem:[%s2576_s17 + $0x58] sm:$0xff] }
 0x1b0   : > { %v1419_v43 = vmax.f32 %v1387_v49, 0.0  ;;  %v3249_v3 = vadd.f32 %v1075_v9, %v913_v60  ;;  %v3251_v58 = vadd.f32 %v1085_v44, %v923_v29  ;;  %v3655_v49 = vld [vmem:[#allocation21_spill] sm:$0xff] }
 0x1b1   : > { %v434_v21 = vpop.permute.xlu0 %433  ;;  %1773 = vmatpush.bf16.msra.mxu3 %v2300_v54  ;;  %v693_v29 = vmul.f32 %v2882_v24, %v3655_v49 }
 0x1b2   : > { %1454 = vst.msk [vmem:[#allocation2 + $0x40] sm:$0xff] %vm1446_vm0, %v1419_v43  ;;  %v496_v41 = vmul.f32 %v2877_v18, %v434_v21  ;;  %v833_v30 = vpop.permute.xlu1 %832 }
 0x1b4   : > { %v722_v11 = vadd.f32 %v690_v1, %v496_v41  ;;  %1248 = vperm.xlu1 %2390, %v1137_v31   ;;  %v3261_v19 = vpop.permute.xlu2 %1026 }
 0x1b5   : > { %1253 = vperm.xlu2 %2389, %v1138_v62  }
 0x1b6   : > { %v916_v4 = vadd.f32 %v884_v27, %v722_v11 }
 0x1b9   : > { %v449_v26 = vpop.permute.xlu0 %448 }
 0x1ba   : > { %v841_v5 = vpop.permute.xlu1 %840  ;;  %v499_v44 = vmul.f32 %v2877_v18, %v449_v26 }
 0x1bb   : > { %v887_v21 = vmul.f32 %v2910_v2, %v841_v5 }
 0x1bc   : > { %1263 = vperm.xlu1 %2390, %v1140_v20   ;;  %v1035_v34 = vpop.permute.xlu2 %1034  ;;  %v725_v1 = vadd.f32 %v693_v29, %v499_v44 }
 0x1bd   : > { %2391 = vset.pattern.permute.xlu2 %v3623_v14  ;;  %v1081_v5 = vmul.f32 %v3071_v51, %v1035_v34 }
 0x1be   : > { %958 = vperm.xlu2 %2391, %v2404_v33   ;;  %v919_v20 = vadd.f32 %v887_v21, %v725_v1  ;;  %v1126_v33 = vld [vmem:[%s2576_s17 + $0x41] sm:$0xff] }
 0x1c0   : > { %v1113_v44 = vadd.f32 %v1081_v5, %v919_v20 }
 0x1c1   : > { %v464_v38 = vpop.permute.xlu0 %463 }
 0x1c2   : > { %v853_v6 = vpop.permute.xlu1 %852  ;;  %v502_v34 = vmul.f32 %v2877_v18, %v464_v38 }
 0x1c3   : > { %v890_v49 = vmul.f32 %v2910_v2, %v853_v6 }
 0x1c4   : > { %2392 = vset.pattern.permute.xlu1 %v3623_v14  ;;  %v3279_v0 = vpop.permute.xlu2 %1046 }
 0x1c5   : > { %966 = vperm.xlu1 %2392, %v2405_v25   ;;  %v1127_v25 = vld [vmem:[%s2576_s17 + $0x49] sm:$0xff] }
 0x1c6   : > { %970 = vperm.xlu2 %2391, %v2406_v32  }
 0x1c9   : > { %v1159_v22 = vpop.permute.xlu0 %1158 }
 0x1ca   : > { %v1313_v9 = vmul.f32 %v3113_v15, %v1159_v22 }
 0x1cb   : > { %v1023_v60 = vpop.permute.xlu1 %1022 }
 0x1cc   : > { %v1345_v14 = vadd.f32 %v1313_v9, %v3138_v17  ;;  %v1078_v43 = vmul.f32 %v3071_v51, %v1023_v60  ;;  %v885_v17 = vmul.f32 %v2910_v2, %v833_v30  ;;  %v1079_v30 = vmul.f32 %v3071_v51, %v3261_v19 }
 0x1cd   : > { %v1274_v31 = vpop.permute.xlu2 %1273  ;;  %974 = vperm.xlu1 %2392, %v2407_v61  }
 0x1ce   : > { %v1381_v41 = vadd.f32 %v3126_v59, %v1345_v14  ;;  %v1110_v62 = vadd.f32 %v1078_v43, %v916_v4  ;;  %v1336_v57 = vmul.f32 %v3113_v15, %v1274_v31  ;;  %978 = vperm.xlu2 %2391, %v2408_v35   ;;  %v917_v32 = vadd.f32 %v885_v17, %v2937_v42  ;;  %v3656_v42 = vld [vmem:[#allocation22_spill] sm:$0xff]  ;;  %v1129_v31 = vld [vmem:[%s2576_s17 + $0x59] sm:$0xff] }
 0x1cf   : > { %v3657_v35 = vld [vmem:[#allocation33_spill] sm:$0xff] }
 0x1d0   : > { %v1413_v27 = vmax.f32 %v1381_v41, 0.0  ;;  %v1368_v11 = vadd.f32 %v1336_v57, %v1110_v62  ;;  %v1111_v14 = vadd.f32 %v1079_v30, %v917_v32  ;;  %v1130_v41 = vld [vmem:[%s2576_s17 + $0x61] sm:$0xff]  ;;  %v1084_v57 = vmul.f32 %v3071_v51, %v3279_v0  ;;  %v1131_v30 = vld [vmem:[%s2576_s17 + $0x69] sm:$0xff] }
 0x1d1   : > { %v1184_v26 = vpop.permute.xlu0 %1183 }
 0x1d2   : > { %1448 = vst.msk [vmem:[#allocation2 + $0x10] sm:$0xff] %vm1446_vm0, %v1413_v27  ;;  %v1404_v10 = vadd.f32 %v3126_v59, %v1368_v11  ;;  %v1318_v28 = vmul.f32 %v3113_v15, %v1184_v26 }
 0x1d3   : > { %v3299_v4 = vpop.permute.xlu1 %1030 }
 0x1d4   : > { %v1436_v13 = vmax.f32 %v1404_v10, 0.0  ;;  %v1350_v54 = vadd.f32 %v1318_v28, %v3155_v8  ;;  %v696_v8 = vmul.f32 %v2882_v24, %v3656_v42 }
 0x1d5   : > { %v1289_v22 = vpop.permute.xlu2 %1288  ;;  %2394 = vset.pattern.permute.xlu1 %v3621_v50 }
 0x1d6   : > { %1471 = vst.msk [vmem:[#allocation2 + $0xc8] sm:$0xff] %vm1446_vm0, %v1436_v13  ;;  %v1386_v9 = vadd.f32 %v3126_v59, %v1350_v54  ;;  %v1339_v60 = vmul.f32 %v3113_v15, %v1289_v22  ;;  %2395 = vset.pattern.permute.xlu2 %v3621_v50  ;;  %1193 = vperm.xlu1 %2394, %v1126_v33  }
 0x1d7   : > { %1198 = vperm.xlu2 %2395, %v1127_v25   ;;  %v728_v38 = vadd.f32 %v696_v8, %v502_v34 }
 0x1d8   : > { %v1418_v18 = vmax.f32 %v1386_v9, 0.0  ;;  %v1371_v19 = vadd.f32 %v1339_v60, %v1113_v44  ;;  %v1132_v9 = vld [vmem:[%s2576_s17 + $0x71] sm:$0xff]  ;;  %s2316_s17 = sshll.u32 %s2541_s28, 4  ;;  %s2095_s28 = scalar_lea.sflag [#allocation5], %s269_s21 }
 0x1d9   : > { %v1279_v29 = vpop.permute.xlu0 %1278  ;;  %v922_v62 = vadd.f32 %v890_v49, %v728_v38  ;;  %v1504_v20 = vld [vmem:[#allocation2 + $0x7] ss:$4 sm:$0xff]  ;;  %v1719_v0 = vld [vmem:[#allocation2 + $0x9] ss:$4 sm:$0xff]  ;;  %v1080_v38 = vmul.f32 %v3071_v51, %v3299_v4  ;;  %s2106_s13 = scalar_lea.hbm %s3588_s7, %s2316_s17 }
 0x1da   : > { %1453 = vst.msk [vmem:[#allocation2 + $0x38] sm:$0xff] %vm1446_vm0, %v1418_v18  ;;  %v1407_v43 = vadd.f32 %v3126_v59, %v1371_v19  ;;  %v1337_v21 = vmul.f32 %v3113_v15, %v1279_v29  ;;  %s2109_s16 = sshll.u32 %s2106_s13, 4  ;;  %s2110_s16 = int_to_ptr.hbm [resolvable:$true] %s2109_s16 }
 0x1db   : > { %v1043_v50 = vpop.permute.xlu1 %1042  ;;  %v1116_v5 = vadd.f32 %v1084_v57, %v922_v62  ;;  %s2423_s18 = sshra.s32 %s2110_s16, 4  ;;  %s2424_s18 = int_to_ptr.hbm [resolvable:$true] %s2423_s18 }
 0x1dc   : > { %v1439_v61 = vmax.f32 %v1407_v43, 0.0  ;;  %v1369_v1 = vadd.f32 %v1337_v21, %v1111_v14  ;;  %v1083_v24 = vmul.f32 %v3071_v51, %v1043_v50  ;;  %s2425_s19 = scalar_lea.hbm %s2424_s18, 16  ;;  %p2430_p0 = scmp.lt.s32.totalorder %s2424_s18, %s3588_s7 }
 0x1dd   : > { %v1299_v2 = vpop.permute.xlu2 %1298  ;;  %p2426_p11 = scmp.ne.s32.totalorder %s2424_s18, %s2425_s19  ;;  %p2431_p1 = scmp.lt.s32.totalorder %s2429_s23, %s2425_s19 }
 0x1de   : > { %1474 = vst.msk [vmem:[#allocation2 + $0xe0] sm:$0xff] %vm1446_vm0, %v1439_v61  ;;  %v1405_v6 = vadd.f32 %v3126_v59, %v1369_v1  ;;  %v1115_v27 = vadd.f32 %v1083_v24, %v3657_v35  ;;  %v1341_v11 = vmul.f32 %v3113_v15, %v1299_v2  ;;  %1208 = vperm.xlu1 %2394, %v1129_v31  }
 0x1df   : > { %1213 = vperm.xlu2 %2395, %v1130_v41   ;;  %v1112_v31 = vadd.f32 %v1080_v38, %v3206_v7  ;;  %p2427_p12 = pnand %p2426_p11, %p2558_p5  ;;  %p2432_p2 = por %p2431_p1, %p2430_p0 }
 0x1e0   : > { %v1437_v17 = vmax.f32 %v1405_v6, 0.0  ;;  %v1373_v26 = vadd.f32 %v1341_v11, %v1115_v27 }
 0x1e1   : > { %v1304_v10 = vpop.permute.xlu0 %1303  ;;  %v1506_v28 = vld [vmem:[#allocation2 + $0x27] ss:$4 sm:$0xff]  ;;  %v1721_v33 = vld [vmem:[#allocation2 + $0x29] ss:$4 sm:$0xff]  ;;  %p2428_p13 = pneg %p2427_p12 }
 0x1e2   : > { %1472 = vst.msk [vmem:[#allocation2 + $0xd0] sm:$0xff] %vm1446_vm0, %v1437_v17  ;;  %v1409_v13 = vadd.f32 %v3126_v59, %v1373_v26  ;;  %v1342_v54 = vmul.f32 %v3113_v15, %v1304_v10  ;;  %v1519_v25 = vpack.c.bf16 %v1506_v28, %v1504_v20  ;;  %v1734_v32 = vpack.c.bf16 %v1721_v33, %v1719_v0  ;;  %v2299_v17 = vld [vmem:[%s3584_s3 + $0x28] sm:$0xff] }
 0x1e3   : > { %1687 = vmatpush.bf16.msrb.mxu2 %v2299_v17  ;;  %p2433_p3 = pnand %p2432_p2, %p2428_p13 }
 0x1e4   : > { %v1441_v34 = vmax.f32 %v1409_v13, 0.0  ;;  %v1374_v22 = vadd.f32 %v1342_v54, %v1116_v5  ;;  %2186 = vmatmul.msk.bf16.vlgmr.msra.gmra.mxu0 %vm1446_vm0, %v1519_v25  ;;  %2222 = vmatmul.msk.bf16.vlgmr.msra.gmra.mxu3 %vm1446_vm0, %v1734_v32  ;;  %v1269_v44 = vpop.permute.xlu1 %1268  ;;  %v2298_v5 = vld [vmem:[%s3584_s3 + $0x20] sm:$0xff] }
 0x1e5   : > { %v1335_v60 = vmul.f32 %v3113_v15, %v1269_v44 }
 0x1e6   : > { %1476 = vst.msk [vmem:[#allocation2 + $0xf0] sm:$0xff] %vm1446_vm0, %v1441_v34  ;;  %v1410_v42 = vadd.f32 %v3126_v59, %v1374_v22  ;;  %v987_v8 = vpop.permute.xlu2 %986  ;;  %1218 = vperm.xlu1 %2394, %v1131_v30  }
 0x1e7   : > { %v1367_v18 = vadd.f32 %v1335_v60, %v3191_v23  ;;  %1223 = vperm.xlu2 %2395, %v1132_v9   ;;  %v1069_v10 = vmul.f32 %v3071_v51, %v987_v8  ;;  %1688 = vmatpush.bf16.msrb.mxu2 %v2298_v5 }
 0x1e8   : > { %v1442_v19 = vmax.f32 %v1410_v42, 0.0 }
 0x1e9   : > { %v1403_v49 = vadd.f32 %v3126_v59, %v1367_v18  ;;  %v1234_v29 = vpop.permute.xlu0 %1233  ;;  %v1101_v13 = vadd.f32 %v1069_v10, %v3208_v16 }
 0x1ea   : > { %1477 = vst.msk [vmem:[#allocation2 + $0xf8] sm:$0xff] %vm1446_vm0, %v1442_v19  ;;  %v1328_v14 = vmul.f32 %v3113_v15, %v1234_v29 }
 0x1eb   : > { %v1435_v43 = vmax.f32 %v1403_v49, 0.0 }
 0x1ec   : > { %v1360_v21 = vadd.f32 %v1328_v14, %v3086_v63  ;;  %v1284_v50 = vpop.permute.xlu1 %1283 }
 0x1ed   : > { %1470 = vst.msk [vmem:[#allocation2 + $0xc0] sm:$0xff] %vm1446_vm0, %v1435_v43  ;;  %v1338_v23 = vmul.f32 %v3113_v15, %v1284_v50 }
 0x1ee   : > { %v1396_v61 = vadd.f32 %v3126_v59, %v1360_v21  ;;  %v999_v4 = vpop.permute.xlu2 %998 }
 0x1ef   : > { %v1370_v1 = vadd.f32 %v1338_v23, %v1112_v31  ;;  %v1072_v34 = vmul.f32 %v3071_v51, %v999_v4 }
 0x1f0   : > { %v1428_v24 = vmax.f32 %v1396_v61, 0.0 }
 0x1f1   : > { %v1406_v41 = vadd.f32 %v3126_v59, %v1370_v1  ;;  %v1259_v62 = vpop.permute.xlu0 %1258  ;;  %v1636_v1 = vld [vmem:[#allocation2 + $0x28] ss:$4 sm:$0xff] }
 0x1f2   : > { %1463 = vst.msk [vmem:[#allocation2 + $0x88] sm:$0xff] %vm1446_vm0, %v1428_v24  ;;  %v1333_v57 = vmul.f32 %v3113_v15, %v1259_v62 }
 0x1f3   : > { %v1438_v63 = vmax.f32 %v1406_v41, 0.0  ;;  %v1634_v41 = vld [vmem:[#allocation2 + $0x8] ss:$4 sm:$0xff] }
 0x1f4   : > { %v1365_v2 = vadd.f32 %v1333_v57, %v3249_v3  ;;  %v1294_v7 = vpop.permute.xlu1 %1293  ;;  %v1649_v62 = vpack.c.bf16 %v1636_v1, %v1634_v41 }
 0x1f5   : > { %1473 = vst.msk [vmem:[#allocation2 + $0xd8] sm:$0xff] %vm1446_vm0, %v1438_v63  ;;  %v1340_v6 = vmul.f32 %v3113_v15, %v1294_v7 }
 0x1f6   : > { %v1401_v35 = vadd.f32 %v3126_v59, %v1365_v2  ;;  %v1007_v27 = vpop.permute.xlu2 %1006 }
 0x1f7   : > { %v1372_v11 = vadd.f32 %v1340_v6, %v3229_v56  ;;  %v1074_v8 = vmul.f32 %v3071_v51, %v1007_v27 }
 0x1f8   : > { %v1433_v26 = vmax.f32 %v1401_v35, 0.0 }
 0x1f9   : > { %v1408_v20 = vadd.f32 %v3126_v59, %v1372_v11  ;;  %v1106_v21 = vadd.f32 %v1074_v8, %v3050_v48 }
 0x1fa   : > { %1468 = vst.msk [vmem:[#allocation2 + $0xb0] sm:$0xff] %vm1446_vm0, %v1433_v26 }
 0x1fb   : > { %v1440_v3 = vmax.f32 %v1408_v20, 0.0 }
 0x1fc   : > { %v1309_v28 = vpop.permute.xlu1 %1308  ;;  %v1516_v19 = vld [vmem:[#allocation2 + $0xc7] ss:$4 sm:$0xff] }
 0x1fd   : > { %1475 = vst.msk [vmem:[#allocation2 + $0xe8] sm:$0xff] %vm1446_vm0, %v1440_v3  ;;  %v1343_v56 = vmul.f32 %v3113_v15, %v1309_v28  ;;  %v2295_v3 = vld [vmem:[%s3584_s3 + $0x8] sm:$0xff] }
 0x1fe   : > { %1610 = vmatpush.bf16.msrb.mxu1 %v2295_v3 }
 0x1ff   : > { %v1375_v0 = vadd.f32 %v1343_v56, %v3251_v58  ;;  %v1229_v33 = vpop.permute.xlu2 %1228  ;;  %v1104_v58 = vadd.f32 %v1072_v34, %v3227_v40 }
 0x200   : > { %v1327_v54 = vmul.f32 %v3113_v15, %v1229_v33 }
 0x201   : > { %v1411_v25 = vadd.f32 %v3126_v59, %v1375_v0 }
 0x202   : > { %v1359_v32 = vadd.f32 %v1327_v54, %v1101_v13 }
 0x203   : > { %v1443_v30 = vmax.f32 %v1411_v25, 0.0 }
 0x204   : > { %v1395_v22 = vadd.f32 %v3126_v59, %v1359_v32 }
 0x205   : > { %1478 = vst.msk [vmem:[#allocation2 + $0x100] sm:$0xff] %vm1446_vm0, %v1443_v30  ;;  %v995_v44 = vpop.permute.xlu1 %994 }
 0x206   : > { %v1427_v9 = vmax.f32 %v1395_v22, 0.0  ;;  %v1071_v24 = vmul.f32 %v3071_v51, %v995_v44  ;;  %v1204_v44 = vpop.permute.xlu0 %1203 }
 0x207   : > { %v1244_v60 = vpop.permute.xlu2 %1243 }
 0x208   : > { %1462 = vst.msk [vmem:[#allocation2 + $0x80] sm:$0xff] %vm1446_vm0, %v1427_v9  ;;  %v1330_v16 = vmul.f32 %v3113_v15, %v1244_v60  ;;  %v1103_v48 = vadd.f32 %v1071_v24, %v3030_v46 }
 0x20a   : > { %v1362_v42 = vadd.f32 %v1330_v16, %v1104_v58  ;;  %v1322_v16 = vmul.f32 %v3113_v15, %v1204_v44 }
 0x20c   : > { %v1398_v18 = vadd.f32 %v3126_v59, %v1362_v42  ;;  %v1518_v38 = vld [vmem:[#allocation2 + $0xe7] ss:$4 sm:$0xff] }
 0x20d   : > { %v1003_v49 = vpop.permute.xlu1 %1002  ;;  %v1522_v29 = vpack.c.bf16 %v1518_v38, %v1516_v19 }
 0x20e   : > { %v1430_v14 = vmax.f32 %v1398_v18, 0.0  ;;  %v1073_v6 = vmul.f32 %v3071_v51, %v1003_v49 }
 0x20f   : > { %v1254_v43 = vpop.permute.xlu2 %1253  ;;  %2189 = vmatmul.msk.bf16.vlgmr.msra.gmra.mxu2 %vm1446_vm0, %v1522_v29 }
 0x210   : > { %1465 = vst.msk [vmem:[#allocation2 + $0x98] sm:$0xff] %vm1446_vm0, %v1430_v14  ;;  %v1332_v40 = vmul.f32 %v3113_v15, %v1254_v43  ;;  %v1105_v17 = vadd.f32 %v1073_v6, %v3098_v12  ;;  %v2294_v12 = vld [vmem:[%s3584_s3] sm:$0xff] }
 0x211   : > { %1611 = vmatpush.bf16.msrb.mxu1 %v2294_v12 }
 0x212   : > { %v1364_v50 = vadd.f32 %v1332_v40, %v1106_v21  ;;  %v2303_v40 = vld [vmem:[%s3584_s3 + $0x48] sm:$0xff] }
 0x213   : > { %1857 = vmatpush.bf16.msrb.mxu0 %v2303_v40 }
 0x214   : > { %v1400_v31 = vadd.f32 %v3126_v59, %v1364_v50 }
 0x215   : > { %v1015_v23 = vpop.permute.xlu1 %1014 }
 0x216   : > { %v1432_v61 = vmax.f32 %v1400_v31, 0.0  ;;  %v1076_v5 = vmul.f32 %v3071_v51, %v1015_v23 }
 0x218   : > { %1467 = vst.msk [vmem:[#allocation2 + $0xa8] sm:$0xff] %vm1446_vm0, %v1432_v61  ;;  %v3386_v4 = vpop.permute.xlu2 %958  ;;  %v1108_v0 = vadd.f32 %v1076_v5, %v3120_v53 }
 0x219   : > { %v1062_v61 = vmul.f32 %v3071_v51, %v3386_v4  ;;  %v2302_v4 = vld [vmem:[%s3584_s3 + $0x40] sm:$0xff] }
 0x21a   : > { %1858 = vmatpush.bf16.msrb.mxu0 %v2302_v4 }
 0x21e   : > { %v1239_v57 = vpop.permute.xlu1 %1238 }
 0x21f   : > { %v1329_v63 = vmul.f32 %v3113_v15, %v1239_v57  ;;  %2210 = vmatmul.msk.bf16.vlgmr.msrb.gmra.mxu2 %vm1446_vm0, %v1649_v62 }
 0x220   : > { %v3392_v2 = vpop.permute.xlu2 %970 }
 0x221   : > { %v1361_v7 = vadd.f32 %v1329_v63, %v1103_v48  ;;  %v1094_v48 = vadd.f32 %v1062_v61, %v2974_v37 }
 0x223   : > { %v1397_v35 = vadd.f32 %v3126_v59, %v1361_v7  ;;  %v1065_v7 = vmul.f32 %v3071_v51, %v3392_v2 }
 0x225   : > { %v1429_v27 = vmax.f32 %v1397_v35, 0.0  ;;  %v1480_v35 = vld [vmem:[#allocation2 + $0x6] ss:$4 sm:$0xff] }
 0x226   : > { %v1249_v11 = vpop.permute.xlu1 %1248 }
 0x227   : > { %1464 = vst.msk [vmem:[#allocation2 + $0x90] sm:$0xff] %vm1446_vm0, %v1429_v27  ;;  %v1331_v26 = vmul.f32 %v3113_v15, %v1249_v11 }
 0x228   : > { %v3399_v46 = vpop.permute.xlu2 %978 }
 0x229   : > { %v1363_v20 = vadd.f32 %v1331_v26, %v1105_v17  ;;  %v1097_v17 = vadd.f32 %v1065_v7, %v2994_v39  ;;  %v1067_v3 = vmul.f32 %v3071_v51, %v3399_v46 }
 0x22b   : > { %v1399_v10 = vadd.f32 %v3126_v59, %v1363_v20 }
 0x22d   : > { %v1431_v28 = vmax.f32 %v1399_v10, 0.0 }
 0x22e   : > { %v1264_v56 = vpop.permute.xlu1 %1263 }
 0x22f   : > { %1466 = vst.msk [vmem:[#allocation2 + $0xa0] sm:$0xff] %vm1446_vm0, %v1431_v28  ;;  %v1334_v33 = vmul.f32 %v3113_v15, %v1264_v56  ;;  %v1099_v28 = vadd.f32 %v1067_v3, %v3062_v52 }
 0x231   : > { %v1366_v13 = vadd.f32 %v1334_v33, %v1108_v0  ;;  %v1199_v54 = vpop.permute.xlu2 %1198 }
 0x232   : > { %v1321_v25 = vmul.f32 %v3113_v15, %v1199_v54 }
 0x233   : > { %v1402_v32 = vadd.f32 %v3126_v59, %v1366_v13 }
 0x234   : > { %v1353_v30 = vadd.f32 %v1321_v25, %v3172_v45 }
 0x235   : > { %v1434_v34 = vmax.f32 %v1402_v32, 0.0 }
 0x236   : > { %v1389_v22 = vadd.f32 %v3126_v59, %v1353_v30  ;;  %v1512_v18 = vld [vmem:[#allocation2 + $0x87] ss:$4 sm:$0xff] }
 0x237   : > { %1469 = vst.msk [vmem:[#allocation2 + $0xb8] sm:$0xff] %vm1446_vm0, %v1434_v34  ;;  %v967_v53 = vpop.permute.xlu1 %966 }
 0x238   : > { %v1421_v9 = vmax.f32 %v1389_v22, 0.0  ;;  %v1064_v60 = vmul.f32 %v3071_v51, %v967_v53 }
 0x239   : > { %v1214_v58 = vpop.permute.xlu2 %1213 }
 0x23a   : > { %1456 = vst.msk [vmem:[#allocation2 + $0x50] sm:$0xff] %vm1446_vm0, %v1421_v9  ;;  %v1096_v42 = vadd.f32 %v1064_v60, %v3048_v47  ;;  %v1324_v14 = vmul.f32 %v3113_v15, %v1214_v58  ;;  %v1488_v60 = vld [vmem:[#allocation2 + $0x86] ss:$4 sm:$0xff] }
 0x23b   : > { %v1804_v58 = vld [vmem:[#allocation2 + $0xa] ss:$4 sm:$0xff] }
 0x23c   : > { %v1354_v8 = vadd.f32 %v1322_v16, %v1096_v42  ;;  %v1642_v42 = vld [vmem:[#allocation2 + $0x88] ss:$4 sm:$0xff] }
 0x23e   : > { %v1390_v45 = vadd.f32 %v3126_v59, %v1354_v8  ;;  %v1514_v19 = vld [vmem:[#allocation2 + $0xa7] ss:$4 sm:$0xff]  ;;  %v1644_v53 = vld [vmem:[#allocation2 + $0xa8] ss:$4 sm:$0xff]  ;;  %v1729_v9 = vld [vmem:[#allocation2 + $0xa9] ss:$4 sm:$0xff] }
 0x23f   : > { %v975_v38 = vpop.permute.xlu1 %974  ;;  %v1521_v49 = vpack.c.bf16 %v1514_v19, %v1512_v18  ;;  %v1727_v8 = vld [vmem:[#allocation2 + $0x89] ss:$4 sm:$0xff]  ;;  %v1651_v18 = vpack.c.bf16 %v1644_v53, %v1642_v42 }
 0x240   : > { %v1422_v29 = vmax.f32 %v1390_v45, 0.0  ;;  %v1066_v43 = vmul.f32 %v3071_v51, %v975_v38  ;;  %v1736_v19 = vpack.c.bf16 %v1729_v9, %v1727_v8  ;;  %v1494_v38 = vld [vmem:[#allocation2 + $0xe6] ss:$4 sm:$0xff] }
 0x241   : > { %v1224_v21 = vpop.permute.xlu2 %1223  ;;  %2188 = vmatmul.msk.bf16.vlgmr.msra.gmra.mxu1 %vm1446_vm0, %v1521_v49 }
 0x242   : > { %1457 = vst.msk [vmem:[#allocation2 + $0x58] sm:$0xff] %vm1446_vm0, %v1422_v29  ;;  %v1098_v47 = vadd.f32 %v1066_v43, %v3189_v36  ;;  %v1326_v50 = vmul.f32 %v3113_v15, %v1224_v21  ;;  %v1648_v29 = vld [vmem:[#allocation2 + $0xe8] ss:$4 sm:$0xff]  ;;  %v1492_v43 = vld [vmem:[#allocation2 + $0xc6] ss:$4 sm:$0xff] }
 0x243   : > { %v1498_v40 = vpack.c.bf16 %v1494_v38, %v1492_v43  ;;  %v2309_v38 = vld [vmem:[%s3586_s5 + $0x28] sm:$0xff] }
 0x244   : > { %v1356_v31 = vadd.f32 %v1324_v14, %v1098_v47  ;;  %v1358_v23 = vadd.f32 %v1326_v50, %v3081_v55  ;;  %v1482_v55 = vld [vmem:[#allocation2 + $0x26] ss:$4 sm:$0xff]  ;;  %v1733_v14 = vld [vmem:[#allocation2 + $0xe9] ss:$4 sm:$0xff]  ;;  %v1646_v47 = vld [vmem:[#allocation2 + $0xc8] ss:$4 sm:$0xff] }
 0x245   : > { %v1495_v27 = vpack.c.bf16 %v1482_v55, %v1480_v35  ;;  %v1731_v50 = vld [vmem:[#allocation2 + $0xc9] ss:$4 sm:$0xff] }
 0x246   : > { %v1392_v1 = vadd.f32 %v3126_v59, %v1356_v31  ;;  %v1394_v24 = vadd.f32 %v3126_v59, %v1358_v23  ;;  %v1652_v23 = vpack.c.bf16 %v1648_v29, %v1646_v47  ;;  %v1737_v61 = vpack.c.bf16 %v1733_v14, %v1731_v50 }
 0x248   : > { %v1424_v41 = vmax.f32 %v1392_v1, 0.0  ;;  %v1426_v62 = vmax.f32 %v1394_v24, 0.0  ;;  %v1194_v57 = vpop.permute.xlu1 %1193  ;;  %v1814_v1 = vld [vmem:[#allocation2 + $0xaa] ss:$4 sm:$0xff] }
 0x249   : > { %v1320_v36 = vmul.f32 %v3113_v15, %v1194_v57  ;;  %v1812_v24 = vld [vmem:[#allocation2 + $0x8a] ss:$4 sm:$0xff] }
 0x24a   : > { %1459 = vst.msk [vmem:[#allocation2 + $0x68] sm:$0xff] %vm1446_vm0, %v1424_v41  ;;  %v1821_v41 = vpack.c.bf16 %v1814_v1, %v1812_v24  ;;  %v1816_v57 = vld [vmem:[#allocation2 + $0xca] ss:$4 sm:$0xff] }
 0x24b   : > { %1461 = vst.msk [vmem:[#allocation2 + $0x78] sm:$0xff] %vm1446_vm0, %v1426_v62  ;;  %v1352_v63 = vadd.f32 %v1320_v36, %v1094_v48  ;;  %v1818_v62 = vld [vmem:[#allocation2 + $0xea] ss:$4 sm:$0xff] }
 0x24c   : > { %v1822_v48 = vpack.c.bf16 %v1818_v62, %v1816_v57 }
 0x24d   : > { %v1388_v6 = vadd.f32 %v3126_v59, %v1352_v63 }
 0x24f   : > { %v1420_v37 = vmax.f32 %v1388_v6, 0.0 }
 0x250   : > { %v1209_v11 = vpop.permute.xlu1 %1208 }
 0x251   : > { %1455 = vst.msk [vmem:[#allocation2 + $0x48] sm:$0xff] %vm1446_vm0, %v1420_v37  ;;  %v1323_v26 = vmul.f32 %v3113_v15, %v1209_v11  ;;  %2198 = vmatmul.msk.bf16.vlgmr.msrb.gmra.mxu1 %vm1446_vm0, %v1495_v27  ;;  %v2307_v27 = vld [vmem:[%s3586_s5 + $0x18] sm:$0xff] }
 0x252   : > { %v2315_v11 = vld [vmem:[%s3586_s5 + $0x58] sm:$0xff]  ;;  %2017 = vmatpush.bf16.msra.mxu2 %v2307_v27 }
 0x253   : > { %v1355_v20 = vadd.f32 %v1323_v26, %v1097_v17  ;;  %2071 = vmatpush.bf16.msrb.mxu3 %v2315_v11 }
 0x255   : > { %v1391_v2 = vadd.f32 %v3126_v59, %v1355_v20  ;;  %v2311_v20 = vld [vmem:[%s3586_s5 + $0x38] sm:$0xff] }
 0x256   : > { %1976 = vmatpush.bf16.msra.mxu1 %v2311_v20 }
 0x257   : > { %v1423_v5 = vmax.f32 %v1391_v2, 0.0 }
 0x258   : > { %v1219_v10 = vpop.permute.xlu1 %1218 }
 0x259   : > { %1458 = vst.msk [vmem:[#allocation2 + $0x60] sm:$0xff] %vm1446_vm0, %v1423_v5  ;;  %v1325_v39 = vmul.f32 %v3113_v15, %v1219_v10  ;;  %v1490_v15 = vld [vmem:[#allocation2 + $0xa6] ss:$4 sm:$0xff] }
 0x25a   : > { %v1497_v16 = vpack.c.bf16 %v1490_v15, %v1488_v60 }
 0x25b   : > { %v1357_v56 = vadd.f32 %v1325_v39, %v1099_v28 }
 0x25d   : > { %v1393_v12 = vadd.f32 %v3126_v59, %v1357_v56  ;;  %v1806_v59 = vld [vmem:[#allocation2 + $0x2a] ss:$4 sm:$0xff] }
 0x25e   : > { %v1819_v45 = vpack.c.bf16 %v1806_v59, %v1804_v58 }
 0x25f   : > { %v1425_v0 = vmax.f32 %v1393_v12, 0.0 }
 0x260   : > { %v1508_v33 = vld [vmem:[#allocation2 + $0x47] ss:$4 sm:$0xff]  ;;  %v1484_v13 = vld [vmem:[#allocation2 + $0x46] ss:$4 sm:$0xff]  ;;  %v1638_v54 = vld [vmem:[#allocation2 + $0x48] ss:$4 sm:$0xff] }
 0x261   : > { %1460 = vst.msk [vmem:[#allocation2 + $0x70] sm:$0xff] %vm1446_vm0, %v1425_v0  ;;  %v1723_v52 = vld [vmem:[#allocation2 + $0x49] ss:$4 sm:$0xff]  ;;  %v1808_v21 = vld [vmem:[#allocation2 + $0x4a] ss:$4 sm:$0xff]  ;;  %v1560_v55 = vpop.f32.mrf.mxu0 }
 0x267   : > { %v1775_v26 = vpop.f32.mrf.mxu3 }
 0x268   : > { %v1510_v51 = vld [vmem:[#allocation2 + $0x67] ss:$4 sm:$0xff]  ;;  %v1486_v46 = vld [vmem:[#allocation2 + $0x66] ss:$4 sm:$0xff]  ;;  %v1640_v25 = vld [vmem:[#allocation2 + $0x68] ss:$4 sm:$0xff] }
 0x269   : > { %v1520_v32 = vpack.c.bf16 %v1510_v51, %v1508_v33  ;;  %v1496_v30 = vpack.c.bf16 %v1486_v46, %v1484_v13  ;;  %v1650_v34 = vpack.c.bf16 %v1640_v25, %v1638_v54  ;;  %v1725_v22 = vld [vmem:[#allocation2 + $0x69] ss:$4 sm:$0xff]  ;;  %v1810_v49 = vld [vmem:[#allocation2 + $0x6a] ss:$4 sm:$0xff]  ;;  %v1562_v6 = vpop.f32.mrf.mxu0  ;;  %v3492_v13 = vld [vmem:[%s3585_s4] ss:$0 sm:$0xff] }
 0x26a   : > { %v1735_v44 = vpack.c.bf16 %v1725_v22, %v1723_v52  ;;  %v1820_v31 = vpack.c.bf16 %v1810_v49, %v1808_v21  ;;  %v2306_v54 = vld [vmem:[%s3586_s5 + $0x10] sm:$0xff] }
 0x26b   : > { %2187 = vmatmul.msk.bf16.gmra.mxu0 %vm1446_vm0, %v1520_v32  ;;  %2199 = vmatmul.msk.bf16.gmra.mxu1 %vm1446_vm0, %v1496_v30  ;;  %v2314_v51 = vld [vmem:[%s3586_s5 + $0x50] sm:$0xff] }
 0x26c   : > { %2211 = vmatmul.msk.bf16.gmra.mxu2 %vm1446_vm0, %v1650_v34  ;;  %2223 = vmatmul.msk.bf16.gmra.mxu3 %vm1446_vm0, %v1735_v44  ;;  %v2310_v32 = vld [vmem:[%s3586_s5 + $0x30] sm:$0xff] }
 0x26d   : > { %2018 = vmatpush.bf16.msra.mxu2 %v2306_v54  ;;  %2072 = vmatpush.bf16.msrb.mxu3 %v2314_v51 }
 0x26e   : > { %1977 = vmatpush.bf16.msra.mxu1 %v2310_v32 }
 0x26f   : > { %v1777_v39 = vpop.f32.mrf.mxu3 }
 0x272   : > { %1978 = vmatpush.bf16.msra.mxu1 %v2309_v38 }
 0x27b   : > { %2200 = vmatmul.msk.bf16.gmra.mxu1 %vm1446_vm0, %v1497_v16  ;;  %2234 = vmatmul.msk.bf16.vlgmr.msrb.gmra.mxu0 %vm1446_vm0, %v1819_v45 }
 0x27c   : > { %2212 = vmatmul.msk.bf16.gmra.mxu2 %vm1446_vm0, %v1651_v18  ;;  %2224 = vmatmul.msk.bf16.gmra.mxu3 %vm1446_vm0, %v1736_v19  ;;  %v2305_v18 = vld [vmem:[%s3586_s5 + $0x8] sm:$0xff] }
 0x27d   : > { %v2313_v19 = vld [vmem:[%s3586_s5 + $0x48] sm:$0xff]  ;;  %2019 = vmatpush.bf16.msra.mxu2 %v2305_v18 }
 0x27e   : > { %2073 = vmatpush.bf16.msrb.mxu3 %v2313_v19 }
 0x28b   : > { %2201 = vmatmul.msk.bf16.gmra.mxu1 %vm1446_vm0, %v1498_v40  ;;  %2235 = vmatmul.msk.bf16.gmra.mxu0 %vm1446_vm0, %v1820_v31 }
 0x28c   : > { %2213 = vmatmul.msk.bf16.gmra.mxu2 %vm1446_vm0, %v1652_v23  ;;  %2225 = vmatmul.msk.bf16.gmra.mxu3 %vm1446_vm0, %v1737_v61 }
 0x292   : > { %v3474_v63 = vpop.f32.mrf.mxu2 }
 0x29a   : > { %v3478_v7 = vpop.f32.mrf.mxu2 }
 0x29b   : > { %2236 = vmatmul.msk.bf16.gmra.mxu0 %vm1446_vm0, %v1821_v41 }
 0x2a2   : > { %v1690_v37 = vpop.f32.mrf.mxu2 }
 0x2aa   : > { %v1692_v2 = vpop.f32.mrf.mxu2 }
 0x2ab   : > { %2237 = vmatmul.msk.bf16.gmra.mxu0 %vm1446_vm0, %v1822_v48 }
 0x2be   : > { %v3472_v36 = vpop.f32.mrf.mxu1 }
 0x2c6   : > { %v3476_v4 = vpop.f32.mrf.mxu1 }
 0x2ce   : > { %v1613_v35 = vpop.f32.mrf.mxu1 }
 0x2cf   : > { %v1614_v5 = vadd.f32 %v1613_v35, %v1560_v55  ;;  %v2304_v35 = vld [vmem:[%s3586_s5] sm:$0xff] }
 0x2d0   : > { %2020 = vmatpush.bf16.msra.mxu2 %v2304_v35 }
 0x2d1   : > { %v1710_v28 = vadd.f32 %v1690_v37, %v1614_v5  ;;  %v2312_v37 = vld [vmem:[%s3586_s5 + $0x40] sm:$0xff] }
 0x2d2   : > { %2074 = vmatpush.bf16.msrb.mxu3 %v2312_v37 }
 0x2d3   : > { %v1795_v33 = vadd.f32 %v1775_v26, %v1710_v28 }
 0x2d6   : > { %v1615_v3 = vpop.f32.mrf.mxu1 }
 0x2d7   : > { %v1616_v0 = vadd.f32 %v1615_v3, %v1562_v6 }
 0x2d9   : > { %v1711_v30 = vadd.f32 %v1692_v2, %v1616_v0 }
 0x2db   : > { %v1796_v15 = vadd.f32 %v1777_v39, %v1711_v30 }
 0x2e8   : > { %v1565_v17 = vpop.f32.mrf.mxu0  ;;  %v1618_v56 = vpop.f32.mrf.mxu1 }
 0x2e9   : > { %v1619_v9 = vadd.f32 %v1618_v56, %v1565_v17 }
 0x2ef   : > { %v1695_v12 = vpop.f32.mrf.mxu2  ;;  %v1780_v52 = vpop.f32.mrf.mxu3 }
 0x2f0   : > { %v1567_v10 = vpop.f32.mrf.mxu0  ;;  %v1620_v44 = vpop.f32.mrf.mxu1  ;;  %v1712_v58 = vadd.f32 %v1695_v12, %v1619_v9 }
 0x2f1   : > { %v1621_v14 = vadd.f32 %v1620_v44, %v1567_v10 }
 0x2f2   : > { %v1797_v45 = vadd.f32 %v1780_v52, %v1712_v58 }
 0x2f7   : > { %v1697_v59 = vpop.f32.mrf.mxu2  ;;  %v1782_v8 = vpop.f32.mrf.mxu3 }
 0x2f8   : > { %v1860_v46 = vpop.f32.mrf.mxu0  ;;  %v1623_v49 = vpop.f32.mrf.mxu1  ;;  %v1713_v40 = vadd.f32 %v1697_v59, %v1621_v14 }
 0x2f9   : > { %v1880_v25 = vadd.f32 %v1860_v46, %v1795_v33  ;;  %v1624_v1 = vadd.f32 %v1623_v49, %v3472_v36  ;;  %v2308_v36 = vld [vmem:[%s3586_s5 + $0x20] sm:$0xff] }
 0x2fa   : > { %v1798_v31 = vadd.f32 %v1782_v8, %v1713_v40  ;;  %1979 = vmatpush.bf16.msra.mxu1 %v2308_v36 }
 0x2fb   : > { %v1892_v34 = vadd.f32 %v3492_v13, %v1880_v25 }
 0x2fd   : > { %v1900_v22 = vmax.f32 %v1892_v34, 0.0 }
 0x2ff   : > { %1911 = vst.msk [vmem:[#allocation3 + $0x8] sm:$0xff] %vm1910_vm3, %v1900_v22  ;;  %v1700_v21 = vpop.f32.mrf.mxu2  ;;  %v1785_v23 = vpop.f32.mrf.mxu3 }
 0x300   : > { %v1862_v53 = vpop.f32.mrf.mxu0  ;;  %v1625_v41 = vpop.f32.mrf.mxu1  ;;  %v1714_v62 = vadd.f32 %v1700_v21, %v1624_v1 }
 0x301   : > { %v1881_v60 = vadd.f32 %v1862_v53, %v1796_v15  ;;  %v1626_v11 = vadd.f32 %v1625_v41, %v3476_v4 }
 0x302   : > { %v1799_v6 = vadd.f32 %v1785_v23, %v1714_v62 }
 0x303   : > { %v1893_v16 = vadd.f32 %v3492_v13, %v1881_v60 }
 0x305   : > { %v1901_v42 = vmax.f32 %v1893_v16, 0.0 }
 0x307   : > { %1912 = vst.msk [vmem:[#allocation3 + $0x10] sm:$0xff] %vm1910_vm3, %v1901_v42  ;;  %v1702_v48 = vpop.f32.mrf.mxu2  ;;  %v1787_v26 = vpop.f32.mrf.mxu3 }
 0x308   : > { %v1865_v29 = vpop.f32.mrf.mxu0  ;;  %v1715_v20 = vadd.f32 %v1702_v48, %v1626_v11  ;;  %v1628_v2 = vpop.f32.mrf.mxu1 }
 0x309   : > { %v1882_v43 = vadd.f32 %v1865_v29, %v1797_v45  ;;  %v1629_v56 = vadd.f32 %v1628_v2, %v3474_v63 }
 0x30a   : > { %v1800_v28 = vadd.f32 %v1787_v26, %v1715_v20 }
 0x30b   : > { %v1894_v47 = vadd.f32 %v3492_v13, %v1882_v43  ;;  %v2403_v43 = vld [vmem:[%s3587_s6] ss:$0 sm:$0xff] }
 0x30d   : > { %v1902_v50 = vmax.f32 %v1894_v47, 0.0 }
 0x30f   : > { %1913 = vst.msk [vmem:[#allocation3 + $0x18] sm:$0xff] %vm1910_vm3, %v1902_v50  ;;  %v1705_v10 = vpop.f32.mrf.mxu2  ;;  %v1790_v33 = vpop.f32.mrf.mxu3 }
 0x310   : > { %v1867_v61 = vpop.f32.mrf.mxu0  ;;  %v1716_v0 = vadd.f32 %v1705_v10, %v1629_v56  ;;  %v1630_v51 = vpop.f32.mrf.mxu1 }
 0x311   : > { %v1883_v24 = vadd.f32 %v1867_v61, %v1798_v31  ;;  %v1631_v30 = vadd.f32 %v1630_v51, %v3478_v7 }
 0x312   : > { %v1801_v46 = vadd.f32 %v1790_v33, %v1716_v0 }
 0x313   : > { %v1895_v57 = vadd.f32 %v3492_v13, %v1883_v24 }
 0x315   : > { %v1903_v55 = vmax.f32 %v1895_v57, 0.0 }
 0x317   : > { %1914 = vst.msk [vmem:[#allocation3 + $0x20] sm:$0xff] %vm1910_vm3, %v1903_v55  ;;  %v1707_v25 = vpop.f32.mrf.mxu2  ;;  %v1792_v63 = vpop.f32.mrf.mxu3 }
 0x318   : > { %v1870_v27 = vpop.f32.mrf.mxu0  ;;  %v1717_v52 = vadd.f32 %v1707_v25, %v1631_v30 }
 0x319   : > { %v1884_v17 = vadd.f32 %v1870_v27, %v1799_v6 }
 0x31a   : > { %v1802_v15 = vadd.f32 %v1792_v63, %v1717_v52 }
 0x31b   : > { %v1896_v3 = vadd.f32 %v3492_v13, %v1884_v17 }
 0x31d   : > { %v1904_v5 = vmax.f32 %v1896_v3, 0.0 }
 0x31e   : > { %v1933_v58 = vld [vmem:[#allocation3 + $0x8] ss:$4 sm:$0xff]  ;;  %v1920_v16 = vld [vmem:[#allocation3 + $0x7] ss:$4 sm:$0xff]  ;;  %v2028_v7 = vld [vmem:[#allocation3 + $0x9] ss:$4 sm:$0xff] }
 0x31f   : > { %1915 = vst.msk [vmem:[#allocation3 + $0x28] sm:$0xff] %vm1910_vm3, %v1904_v5 }
 0x320   : > { %v1872_v39 = vpop.f32.mrf.mxu0 }
 0x321   : > { %v1885_v12 = vadd.f32 %v1872_v39, %v1800_v28 }
 0x323   : > { %v1897_v4 = vadd.f32 %v3492_v13, %v1885_v12 }
 0x325   : > { %v1905_v54 = vmax.f32 %v1897_v4, 0.0 }
 0x327   : > { %1916 = vst.msk [vmem:[#allocation3 + $0x30] sm:$0xff] %vm1910_vm3, %v1905_v54 }
 0x328   : > { %v1875_v32 = vpop.f32.mrf.mxu0 }
 0x329   : > { %v1886_v34 = vadd.f32 %v1875_v32, %v1801_v46 }
 0x32b   : > { %v1898_v22 = vadd.f32 %v3492_v13, %v1886_v34 }
 0x32d   : > { %v1906_v44 = vmax.f32 %v1898_v22, 0.0 }
 0x32f   : > { %1917 = vst.msk [vmem:[#allocation3 + $0x38] sm:$0xff] %vm1910_vm3, %v1906_v44 }
 0x330   : > { %v1877_v59 = vpop.f32.mrf.mxu0 }
 0x331   : > { %v1887_v53 = vadd.f32 %v1877_v59, %v1802_v15 }
 0x333   : > { %v1899_v9 = vadd.f32 %v3492_v13, %v1887_v53 }
 0x335   : > { %v1907_v60 = vmax.f32 %v1899_v9, 0.0 }
 0x337   : > { %1918 = vst.msk [vmem:[#allocation3 + $0x40] sm:$0xff] %vm1910_vm3, %v1907_v60 }
 0x33e   : > { %v1935_v42 = vld [vmem:[#allocation3 + $0x28] ss:$4 sm:$0xff]  ;;  %v1922_v8 = vld [vmem:[#allocation3 + $0x27] ss:$4 sm:$0xff]  ;;  %v2030_v45 = vld [vmem:[#allocation3 + $0x29] ss:$4 sm:$0xff] }
 0x33f   : > { %v1936_v18 = vpack.c.bf16 %v1935_v42, %v1933_v58  ;;  %v1923_v19 = vpack.c.bf16 %v1922_v8, %v1920_v16  ;;  %v2031_v38 = vpack.c.bf16 %v2030_v45, %v2028_v7 }
 0x341   : > { %2254 = vmatmul.msk.bf16.vlgmr.msra.gmra.mxu1 %vm1910_vm3, %v1936_v18  ;;  %2271 = vmatmul.msk.bf16.vlgmr.msra.gmra.mxu2 %vm1910_vm3, %v1923_v19 }
 0x342   : > { %2288 = vmatmul.msk.bf16.vlgmr.msrb.gmra.mxu3 %vm1910_vm3, %v2031_v38 }
 0x3be   : > { %v1981_v13 = vpop.f32.mrf.mxu1 }
 0x3c4   : > { %v2022_v49 = vpop.f32.mrf.mxu2 }
 0x3c5   : > { %v2023_v29 = vadd.f32 %v2022_v49, %v1981_v13  ;;  %v2076_v14 = vpop.f32.mrf.mxu3 }
 0x3c6   : > { %v1983_v50 = vpop.f32.mrf.mxu1 }
 0x3c7   : > { %v2081_v21 = vadd.f32 %v2076_v14, %v2023_v29 }
 0x3c9   : > { %v2087_v40 = vadd.f32 %v2403_v43, %v2081_v21 }
 0x3cb   : > { %v2089_v47 = vmax.f32 %v2087_v40, 0.0 }
 0x3cc   : > { %v2024_v31 = vpop.f32.mrf.mxu2 }
 0x3cd   : > { %2092 = vst.msk [vmem:[%s271_s14] sm:$0xff] %vm2091_vm4, %v2089_v47  ;;  %v2025_v23 = vadd.f32 %v2024_v31, %v1983_v50  ;;  %v2078_v61 = vpop.f32.mrf.mxu3 }
 0x3cf   : > { %v2082_v1 = vadd.f32 %v2078_v61, %v2025_v23 }
 0x3d1   : > { %v2088_v24 = vadd.f32 %v2403_v43, %v2082_v1 }
 0x3d3   : > { %v2090_v41 = vmax.f32 %v2088_v24, 0.0 }
 0x3d5   : > { %2093 = vst.msk [vmem:[%s271_s14 + $0x8] sm:$0xff] %vm2091_vm4, %v2090_v41 }
 0x3d6   : > { %2436 = shalt.err (!%p2433_p3)
}
 0x3d7   : > { %s2478_s21 = smov 128   ;;  %s2479_s8 = smov 8  }
 0x3d8   : > { %2322 = dma.vmem_to_hbm [thread:$0]  (%p2558_p5), %s2108_s15, 256, %s2110_s16, %s2095_s28, %s2478_s21, %s2478_s21, %s2479_s8  }
 0x3d9 PF: > { %p2328_p4 = scmp.ge.s32.totalorder %s2471_s27, 2  ;;  %s2124_s9 = sand.u32 1, %s2459_s24  }
 0x3da   : > { %s2125_s13 = scalar_lea.sflag [#allocation5], %s2124_s9 }
 0x3db   : > { %p2325_p7 = pnand %p2328_p4, %p2562_p6 }
 0x3dd   : > { %p2326_p8 = pneg %p2325_p7 }
 0x3df   : > { %2454 = dma.done.wait (%p2326_p8), %s2125_s13, 256  }
 0x3e0   : > { %2456 = vsyncadd (%p2326_p8), %s2125_s13, 4294967040  ;;  %p17_p9 = scmp.ge.s32.totalorder %s2545_s30, 4   ;;  %s3658_s24 = smov %s2463_s25 }
 0x3e1   : > { %s3659_s25 = smov %s2467_s26  ;;  %s3660_s26 = smov %s2556_s10 }
 0x3e2   : > { %s3661_s27 = smov %s2545_s30  ;;  %19 = sbr.rel (!%p17_p9) target bundleno = 3 (0x3), region = 129 }
 0x3e7   :  { %2131 = vsyncpa [#allocation5], 1 }
 0x3e8   :  { %2133 = vsyncpa [#allocation5 + $0x1], 1 }

</bundles_post_ra>
